<compile_context>
chip_gen: v7x
topology: tpu7x:2x2x1
jax: 0.10.0
libtpu: 0.0.40
codegen_flags: <defaults>
</compile_context>

<pallas_src>
import functools

import jax
import jax.numpy as jnp
from jax import lax
from jax.experimental import pallas as pl
from jax.experimental.pallas import tpu as pltpu

LN_EPS = 1e-5
LANE = 128

WEIGHT_ORDER = ("ln1_g", "ln1_b", "w_qkv", "w_out", "b_out",
                "ln2_g", "ln2_b", "w1", "b1", "w2", "b2")


def _round_up(n, m):
    return ((n + m - 1) // m) * m


def _gelu_tanh(x):
    # tanh-based GELU (max |err| vs exact erf-GELU ~ 5e-4, well within the test
    # tolerance); tanh goes to the EUP slot instead of a VALU erf polynomial.
    c = 0.7978845608028654  # sqrt(2/pi)
    return 0.5 * x * (1.0 + jnp.tanh(c * (x + 0.044715 * x * x * x)))


def _pick_vmem_limit():
    try:
        cap = pltpu.get_tpu_info().vmem_capacity_bytes
        return max(32 * 1024 * 1024, int(cap * 0.85))
    except Exception:
        return 48 * 1024 * 1024


def layer_kernel(x_ref, ln1g_ref, ln1b_ref, wqkv_ref, wout_ref, bout_ref,
                 ln2g_ref, ln2b_ref, w1_ref, b1_ref, w2_ref, b2_ref,
                 o_ref, acc_ref, *, heads, dh, d_real, inner_p):
    l = pl.program_id(1)

    # Layer 0 of each batch element: pull the (padded) input into the resident
    # VMEM residual-stream scratch.  Later layers read the previous layer's
    # output straight from VMEM (no HBM round-trip between layers).
    @pl.when(l == 0)
    def _():
        acc_ref[...] = x_ref[0]

    x = acc_ref[...]                                   # (N, Dp) f32
    n_tok, d_pad = x.shape
    inv_d = 1.0 / float(d_real)

    # Mask of real (non-padded) channels; x's padded lanes are exactly zero.
    lane = lax.broadcasted_iota(jnp.int32, (1, d_pad), 1)
    dmask = lane < d_real

    def layernorm(t, g, b):
        # Two-pass form over the real channels only (padded lanes masked to 0).
        mu = jnp.sum(t, axis=-1, keepdims=True) * inv_d
        tc = jnp.where(dmask, t - mu, 0.0)
        var = jnp.sum(tc * tc, axis=-1, keepdims=True) * inv_d
        return tc * lax.rsqrt(var + LN_EPS) * g + b

    # ---------------- PreNorm + multi-head attention ----------------
    xn = layernorm(x, ln1g_ref[0], ln1b_ref[0])                        # (N, Dp) f32
    # Single fused QKV GEMM; 1/sqrt(dim_head) already folded into the Q columns.
    qkv = jnp.dot(xn.astype(jnp.bfloat16), wqkv_ref[0],
                  preferred_element_type=jnp.float32)                  # (N, 3*inner_p)

    w_out = wout_ref[0]                                                # (inner, Dp) bf16
    attn_out = jnp.zeros((n_tok, d_pad), jnp.float32)
    for h in range(heads):
        q = qkv[:, 0 * inner_p + h * dh: 0 * inner_p + (h + 1) * dh].astype(jnp.bfloat16)
        k = qkv[:, 1 * inner_p + h * dh: 1 * inner_p + (h + 1) * dh].astype(jnp.bfloat16)
        v = qkv[:, 2 * inner_p + h * dh: 2 * inner_p + (h + 1) * dh].astype(jnp.bfloat16)

        dots = jnp.einsum('qd,kd->qk', q, k,
                          preferred_element_type=jnp.float32)          # (N, N) f32
        dots = dots - jnp.max(dots, axis=-1, keepdims=True)
        e = jnp.exp(dots)
        p = e * pl.reciprocal(jnp.sum(e, axis=-1, keepdims=True), approx=True)

        o_h = jnp.einsum('qk,kd->qd', p.astype(jnp.bfloat16), v,
                         preferred_element_type=jnp.float32)           # (N, dh) f32
        # Per-head slice of the output projection; accumulate in f32 so the
        # head-concat + big matmul is never materialized.
        attn_out = attn_out + jnp.dot(o_h.astype(jnp.bfloat16),
                                      w_out[h * dh:(h + 1) * dh, :],
                                      preferred_element_type=jnp.float32)

    x1 = x + attn_out + bout_ref[0]                                    # residual, f32

    # ---------------- PreNorm + MLP ----------------
    xn2 = layernorm(x1, ln2g_ref[0], ln2b_ref[0])
    h1 = jnp.dot(xn2.astype(jnp.bfloat16), w1_ref[0],
                 preferred_element_type=jnp.float32) + b1_ref[0]
    h1 = _gelu_tanh(h1)
    ff = jnp.dot(h1.astype(jnp.bfloat16), w2_ref[0],
                 preferred_element_type=jnp.float32) + b2_ref[0]

    new_x = x1 + ff
    acc_ref[...] = new_x                      # carry residual stream to layer l+1
    o_ref[0] = new_x.astype(o_ref.dtype)      # flushed to HBM after the last layer


def prepare_params(params, *, dim, heads, dim_head, mlp_dim):
    """Pad to lane-dense shapes, build the fused head-major QKV matrix with the
    softmax scale folded into Q, cast matmul weights to bf16, and stack every
    weight over the layer axis (so one pallas_call streams all layers)."""
    inner = heads * dim_head
    Dp = _round_up(dim, LANE)
    Hp = _round_up(mlp_dim, LANE)
    inner_p = _round_up(inner, LANE)
    scale = dim_head ** -0.5

    def pad2(w, rows, cols):
        return jnp.pad(w, ((0, rows - w.shape[0]), (0, cols - w.shape[1])))

    def vec(v, width):                        # (1, n) -> (1, width), zero pad
        v = v.reshape(1, -1)
        return jnp.pad(v, ((0, 0), (0, width - v.shape[1])))

    layers = []
    for p in params:
        wq = p["w_qkv"][:, 0 * inner:1 * inner] * scale   # fold softmax scale into Q
        wk = p["w_qkv"][:, 1 * inner:2 * inner]
        wv = p["w_qkv"][:, 2 * inner:3 * inner]
        w_qkv2d = jnp.concatenate(
            [pad2(wq, Dp, inner_p), pad2(wk, Dp, inner_p), pad2(wv, Dp, inner_p)],
            axis=-1).astype(jnp.bfloat16)                 # (Dp, 3*inner_p), sections 128-aligned

        layers.append(dict(
            ln1_g=vec(p["ln1_g"], Dp), ln1_b=vec(p["ln1_b"], Dp),
            w_qkv=w_qkv2d,
            w_out=jnp.pad(p["w_out"], ((0, 0), (0, Dp - dim))).astype(jnp.bfloat16),  # (inner, Dp)
            b_out=vec(p["b_out"], Dp),
            ln2_g=vec(p["ln2_g"], Dp), ln2_b=vec(p["ln2_b"], Dp),
            w1=pad2(p["w1"], Dp, Hp).astype(jnp.bfloat16),
            b1=vec(p["b1"], Hp),
            w2=pad2(p["w2"], Hp, Dp).astype(jnp.bfloat16),
            b2=vec(p["b2"], Dp),
        ))

    stacked = {k: jnp.stack([lay[k] for lay in layers], axis=0) for k in WEIGHT_ORDER}
    return stacked, Dp, inner_p


def transformer_forward(x, params, *, dim, heads, dim_head, mlp_dim):
    stacked, Dp, inner_p = prepare_params(params, dim=dim, heads=heads,
                                          dim_head=dim_head, mlp_dim=mlp_dim)
    depth = len(params)
    B, N, _ = x.shape
    # Pad the channel (lane) dim once; padded lanes stay exactly zero through
    # every layer (all padded weight rows/cols and biases are zero).
    x_pad = jnp.pad(x, ((0, 0), (0, 0), (0, Dp - dim)))

    weights = [stacked[k] for k in WEIGHT_ORDER]

    def layer_idx_map(nd):
        return lambda b, l, _nd=nd: (l,) + (0,) * (_nd - 1)

    w_specs = [pl.BlockSpec((1,) + w.shape[1:], layer_idx_map(w.ndim)) for w in weights]

    kernel = functools.partial(layer_kernel, heads=heads, dh=dim_head,
                               d_real=dim, inner_p=inner_p)

    out = pl.pallas_call(
        kernel,
        out_shape=jax.ShapeDtypeStruct((B, N, Dp), x_pad.dtype),
        grid=(B, depth),
        in_specs=[pl.BlockSpec((1, N, Dp), lambda b, l: (b, 0, 0))] + w_specs,
        out_specs=pl.BlockSpec((1, N, Dp), lambda b, l: (b, 0, 0)),
        scratch_shapes=[pltpu.VMEM((N, Dp), jnp.float32)],     # resident residual stream
        compiler_params=pltpu.CompilerParams(
            dimension_semantics=("parallel", "arbitrary"),     # batch parallel, layers sequential
            vmem_limit_bytes=_pick_vmem_limit(),
        ),
    )(x_pad, *weights)

    return out[..., :dim]


# ------------------------- parameter init (deterministic) -------------------------
def init_params(key, dim, depth, heads, dim_head, mlp_dim):
    inner = heads * dim_head
    params = []
    for layer in range(depth):
        ks = jax.random.split(jax.random.fold_in(key, layer), 8)
        params.append(dict(
            ln1_g=jnp.ones((1, dim), jnp.float32),
            ln1_b=jnp.zeros((1, dim), jnp.float32),
            w_qkv=0.05 * jax.random.normal(ks[0], (dim, 3 * inner), jnp.float32),
            w_out=0.05 * jax.random.normal(ks[1], (inner, dim), jnp.float32),
            b_out=0.05 * jax.random.normal(ks[2], (1, dim), jnp.float32),
            ln2_g=jnp.ones((1, dim), jnp.float32),
            ln2_b=jnp.zeros((1, dim), jnp.float32),
            w1=0.05 * jax.random.normal(ks[3], (dim, mlp_dim), jnp.float32),
            b1=0.05 * jax.random.normal(ks[4], (1, mlp_dim), jnp.float32),
            w2=0.05 * jax.random.normal(ks[5], (mlp_dim, dim), jnp.float32),
            b2=0.05 * jax.random.normal(ks[6], (1, dim), jnp.float32),
        ))
    return params


# ------------------------- pure-JAX f32 reference for verification -------------------------
def reference_forward(x, params, *, heads, dim_head):
    def ln(t, g, b):
        mu = jnp.mean(t, -1, keepdims=True)
        var = jnp.mean((t - mu) ** 2, -1, keepdims=True)
        return (t - mu) / jnp.sqrt(var + LN_EPS) * g + b

    B, N, _ = x.shape
    for p in params:
        xn = ln(x, p["ln1_g"], p["ln1_b"])
        qkv = xn @ p["w_qkv"]
        q, k, v = jnp.split(qkv, 3, axis=-1)
        sh = lambda t: t.reshape(B, N, heads, dim_head).transpose(0, 2, 1, 3)
        q, k, v = sh(q), sh(k), sh(v)
        dots = jnp.einsum("bhnd,bhmd->bhnm", q, k) * dim_head ** -0.5
        attn = jax.nn.softmax(dots, axis=-1)
        out = jnp.einsum("bhnm,bhmd->bhnd", attn, v)
        out = out.transpose(0, 2, 1, 3).reshape(B, N, heads * dim_head)
        x = x + out @ p["w_out"] + p["b_out"]
        xn2 = ln(x, p["ln2_g"], p["ln2_b"])
        h = jax.nn.gelu(xn2 @ p["w1"] + p["b1"], approximate=False)
        x = x + h @ p["w2"] + p["b2"]
    return x


if __name__ == "__main__":
    B, N = 2, 8           # batch, tokens
    dim = 32              # model dim
    depth = 2
    heads, dim_head = 4, 8
    mlp_dim = 64

    key = jax.random.PRNGKey(0)
    kx, kp = jax.random.split(key)
    x = jax.random.normal(kx, (B, N, dim), jnp.float32)
    params = init_params(kp, dim, depth, heads, dim_head, mlp_dim)

    out = transformer_forward(x, params, dim=dim, heads=heads,
                              dim_head=dim_head, mlp_dim=mlp_dim)
    out = jax.block_until_ready(out)

    ref = jax.block_until_ready(reference_forward(x, params, heads=heads, dim_head=dim_head))
    assert out.shape == (B, N, dim)
    # Tolerance loosened vs the f32 reference: kernel uses bf16 MXU operands
    # (f32 accumulation), tanh-approx GELU and approx reciprocal in the softmax.
    max_err = float(jnp.max(jnp.abs(out - ref)))
    assert jnp.allclose(out, ref, atol=3e-2, rtol=3e-2), f"mismatch vs reference (max abs err {max_err})"

    print("KERNEL_OK")
</pallas_src>

<mosaic_0001>
module attributes {stable_mosaic.version = 11 : i64} {
  func.func @layer_kernel(%arg0: i32, %arg1: i32, %arg2: memref<1x8x128xf32, #tpu.memory_space<vmem>>, %arg3: memref<1x1x128xf32, #tpu.memory_space<vmem>>, %arg4: memref<1x1x128xf32, #tpu.memory_space<vmem>>, %arg5: memref<1x128x384xbf16, #tpu.memory_space<vmem>>, %arg6: memref<1x32x128xbf16, #tpu.memory_space<vmem>>, %arg7: memref<1x1x128xf32, #tpu.memory_space<vmem>>, %arg8: memref<1x1x128xf32, #tpu.memory_space<vmem>>, %arg9: memref<1x1x128xf32, #tpu.memory_space<vmem>>, %arg10: memref<1x128x128xbf16, #tpu.memory_space<vmem>>, %arg11: memref<1x1x128xf32, #tpu.memory_space<vmem>>, %arg12: memref<1x128x128xbf16, #tpu.memory_space<vmem>>, %arg13: memref<1x1x128xf32, #tpu.memory_space<vmem>>, %arg14: memref<1x8x128xf32, #tpu.memory_space<vmem>>, %arg15: memref<8x128xf32, #tpu.memory_space<vmem>>) attributes {dimension_semantics = [#tpu.dimension_semantics<parallel>, #tpu.dimension_semantics<arbitrary>], iteration_bounds = array<i64: 2, 2>, scalar_prefetch = 0 : i64, scratch_operands = 1 : i64, tpu.core_type = #tpu.core_type<tc>, window_params = [{transform_indices = @transform_0, window_bounds = array<i64: 1, 8, 128>}, {transform_indices = @transform_1, window_bounds = array<i64: 1, 1, 128>}, {transform_indices = @transform_2, window_bounds = array<i64: 1, 1, 128>}, {transform_indices = @transform_3, window_bounds = array<i64: 1, 128, 384>}, {transform_indices = @transform_4, window_bounds = array<i64: 1, 32, 128>}, {transform_indices = @transform_5, window_bounds = array<i64: 1, 1, 128>}, {transform_indices = @transform_6, window_bounds = array<i64: 1, 1, 128>}, {transform_indices = @transform_7, window_bounds = array<i64: 1, 1, 128>}, {transform_indices = @transform_8, window_bounds = array<i64: 1, 128, 128>}, {transform_indices = @transform_9, window_bounds = array<i64: 1, 1, 128>}, {transform_indices = @transform_10, window_bounds = array<i64: 1, 128, 128>}, {transform_indices = @transform_11, window_bounds = array<i64: 1, 1, 128>}, {transform_indices = @transform_12, window_bounds = array<i64: 1, 8, 128>}]} {
    %c0_i32 = arith.constant 0 : i32
    %0 = arith.cmpi eq, %arg1, %c0_i32 : i32
    %1 = arith.extui %0 : i1 to i32
    %c0_i32_0 = arith.constant 0 : i32
    %2 = arith.cmpi ne, %1, %c0_i32_0 : i32
    scf.if %2 {
      %c0_79 = arith.constant 0 : index
      %c0_80 = arith.constant 0 : index
      %c0_81 = arith.constant 0 : index
      %201 = vector.load %arg2[%c0_79, %c0_80, %c0_81] : memref<1x8x128xf32, #tpu.memory_space<vmem>>, vector<1x8x128xf32>
      %202 = vector.shape_cast %201 : vector<1x8x128xf32> to vector<8x128xf32>
      %c0_82 = arith.constant 0 : index
      %c0_83 = arith.constant 0 : index
      %203 = vector.load %arg15[%c0_82, %c0_83] : memref<8x128xf32, #tpu.memory_space<vmem>>, vector<8x128xf32>
      tpu.vector_store %arg15[%c0_82, %c0_83], %202 {strides = array<i32>} : memref<8x128xf32, #tpu.memory_space<vmem>>, vector<8x128xf32>,
    } else {
    }
    %c0 = arith.constant 0 : index
    %c0_1 = arith.constant 0 : index
    %3 = vector.load %arg15[%c0, %c0_1] : memref<8x128xf32, #tpu.memory_space<vmem>>, vector<8x128xf32>
    %4 = tpu.iota {dimensions = array<i32: 1>} : vector<1x128xi32>
    %c32_i32 = arith.constant 32 : i32
    %5 = vector.broadcast %c32_i32 : i32 to vector<1x128xi32>
    %6 = arith.cmpi slt, %4, %5 : vector<1x128xi32>
    %c0_2 = arith.constant 0 : index
    %c0_3 = arith.constant 0 : index
    %c0_4 = arith.constant 0 : index
    %7 = vector.load %arg3[%c0_2, %c0_3, %c0_4] : memref<1x1x128xf32, #tpu.memory_space<vmem>>, vector<1x1x128xf32>
    %8 = vector.shape_cast %7 : vector<1x1x128xf32> to vector<1x128xf32>
    %c0_5 = arith.constant 0 : index
    %c0_6 = arith.constant 0 : index
    %c0_7 = arith.constant 0 : index
    %9 = vector.load %arg4[%c0_5, %c0_6, %c0_7] : memref<1x1x128xf32, #tpu.memory_space<vmem>>, vector<1x1x128xf32>
    %10 = vector.shape_cast %9 : vector<1x1x128xf32> to vector<1x128xf32>
    %cst = arith.constant dense<0.000000e+00> : vector<8xf32>
    %11 = vector.multi_reduction <add>, %3, %cst [1] : vector<8x128xf32> to vector<8xf32>
    %12 = vector.shape_cast %11 : vector<8xf32> to vector<8x1xf32>
    %cst_8 = arith.constant 3.125000e-02 : f32
    %13 = vector.broadcast %cst_8 : f32 to vector<8x1xf32>
    %14 = arith.mulf %12, %13 : vector<8x1xf32>
    %15 = vector.broadcast %14 : vector<8x1xf32> to vector<8x128xf32>
    %16 = arith.subf %3, %15 : vector<8x128xf32>
    %cst_9 = arith.constant 0.000000e+00 : f32
    %17 = vector.shape_cast %6 : vector<1x128xi1> to vector<1x128xi1>
    %18 = vector.broadcast %17 : vector<1x128xi1> to vector<8x128xi1>
    %19 = vector.broadcast %cst_9 : f32 to vector<8x128xf32>
    %20 = arith.select %18, %16, %19 : vector<8x128xi1>, vector<8x128xf32>
    %21 = arith.mulf %20, %20 : vector<8x128xf32>
    %cst_10 = arith.constant dense<0.000000e+00> : vector<8xf32>
    %22 = vector.multi_reduction <add>, %21, %cst_10 [1] : vector<8x128xf32> to vector<8xf32>
    %23 = vector.shape_cast %22 : vector<8xf32> to vector<8x1xf32>
    %cst_11 = arith.constant 3.125000e-02 : f32
    %24 = vector.broadcast %cst_11 : f32 to vector<8x1xf32>
    %25 = arith.mulf %23, %24 : vector<8x1xf32>
    %cst_12 = arith.constant 9.99999974E-6 : f32
    %26 = vector.broadcast %cst_12 : f32 to vector<8x1xf32>
    %27 = arith.addf %25, %26 : vector<8x1xf32>
    %28 = math.rsqrt %27 : vector<8x1xf32>
    %29 = vector.broadcast %28 : vector<8x1xf32> to vector<8x128xf32>
    %30 = arith.mulf %20, %29 : vector<8x128xf32>
    %31 = vector.broadcast %8 : vector<1x128xf32> to vector<8x128xf32>
    %32 = arith.mulf %30, %31 : vector<8x128xf32>
    %33 = vector.broadcast %10 : vector<1x128xf32> to vector<8x128xf32>
    %34 = arith.addf %32, %33 : vector<8x128xf32>
    %35 = arith.truncf %34 : vector<8x128xf32> to vector<8x128xbf16>
    %c0_13 = arith.constant 0 : index
    %c0_14 = arith.constant 0 : index
    %c0_15 = arith.constant 0 : index
    %36 = vector.load %arg5[%c0_13, %c0_14, %c0_15] : memref<1x128x384xbf16, #tpu.memory_space<vmem>>, vector<1x128x384xbf16>
    %37 = vector.shape_cast %36 : vector<1x128x384xbf16> to vector<128x384xbf16>
    %cst_16 = arith.constant dense<0.000000e+00> : vector<8x384xf32>
    %38 = tpu.matmul %35, %37, %cst_16 {dimension_numbers = #tpu.dot_dimension_numbers<[1], [0], [0], [1], [0, 0, 1, 1], [], []>} : vector<8x128xbf16>, vector<128x384xbf16>, vector<8x384xf32> -> vector<8x384xf32>
    %c0_17 = arith.constant 0 : index
    %c0_18 = arith.constant 0 : index
    %c0_19 = arith.constant 0 : index
    %39 = vector.load %arg6[%c0_17, %c0_18, %c0_19] : memref<1x32x128xbf16, #tpu.memory_space<vmem>>, vector<1x32x128xbf16>
    %40 = vector.shape_cast %39 : vector<1x32x128xbf16> to vector<32x128xbf16>
    %cst_20 = arith.constant 0.000000e+00 : f32
    %41 = vector.broadcast %cst_20 : f32 to vector<8x128xf32>
    %42 = vector.extract_strided_slice %38 {offsets = [0, 0], sizes = [8, 8], strides = [1, 1]} : vector<8x384xf32> to vector<8x8xf32>
    %43 = arith.truncf %42 : vector<8x8xf32> to vector<8x8xbf16>
    %44 = vector.extract_strided_slice %38 {offsets = [0, 128], sizes = [8, 8], strides = [1, 1]} : vector<8x384xf32> to vector<8x8xf32>
    %45 = arith.truncf %44 : vector<8x8xf32> to vector<8x8xbf16>
    %46 = vector.extract_strided_slice %38 {offsets = [0, 256], sizes = [8, 8], strides = [1, 1]} : vector<8x384xf32> to vector<8x8xf32>
    %47 = arith.truncf %46 : vector<8x8xf32> to vector<8x8xbf16>
    "tpu.trace_start"() <{level = 10 : i32, message = "qd,kd->qk"}> : () -> ()
    %cst_21 = arith.constant dense<0.000000e+00> : vector<8x8xf32>
    %48 = tpu.matmul %43, %45, %cst_21 {dimension_numbers = #tpu.dot_dimension_numbers<[1], [1], [0], [0], [0, 0, 1, 0], [], []>} : vector<8x8xbf16>, vector<8x8xbf16>, vector<8x8xf32> -> vector<8x8xf32>
    "tpu.trace_stop"() : () -> ()
    %cst_22 = arith.constant dense<0xFF800000> : vector<8xf32>
    %49 = vector.multi_reduction <maximumf>, %48, %cst_22 [1] : vector<8x8xf32> to vector<8xf32>
    %50 = vector.shape_cast %49 : vector<8xf32> to vector<8x1xf32>
    %51 = vector.broadcast %50 : vector<8x1xf32> to vector<8x8xf32>
    %52 = arith.subf %48, %51 : vector<8x8xf32>
    %53 = math.exp %52 : vector<8x8xf32>
    %cst_23 = arith.constant dense<0.000000e+00> : vector<8xf32>
    %54 = vector.multi_reduction <add>, %53, %cst_23 [1] : vector<8x8xf32> to vector<8xf32>
    %55 = vector.shape_cast %54 : vector<8xf32> to vector<8x1xf32>
    %56 = tpu.reciprocal %55 {approx = true} : vector<8x1xf32> -> vector<8x1xf32>
    %57 = vector.broadcast %56 : vector<8x1xf32> to vector<8x8xf32>
    %58 = arith.mulf %53, %57 : vector<8x8xf32>
    %59 = arith.truncf %58 : vector<8x8xf32> to vector<8x8xbf16>
    "tpu.trace_start"() <{level = 10 : i32, message = "qk,kd->qd"}> : () -> ()
    %cst_24 = arith.constant dense<0.000000e+00> : vector<8x8xf32>
    %60 = tpu.matmul %59, %47, %cst_24 {dimension_numbers = #tpu.dot_dimension_numbers<[1], [0], [0], [1], [0, 0, 1, 1], [], []>} : vector<8x8xbf16>, vector<8x8xbf16>, vector<8x8xf32> -> vector<8x8xf32>
    "tpu.trace_stop"() : () -> ()
    %61 = arith.truncf %60 : vector<8x8xf32> to vector<8x8xbf16>
    %62 = vector.extract_strided_slice %40 {offsets = [0, 0], sizes = [8, 128], strides = [1, 1]} : vector<32x128xbf16> to vector<8x128xbf16>
    %cst_25 = arith.constant dense<0.000000e+00> : vector<8x128xf32>
    %63 = tpu.matmul %61, %62, %cst_25 {dimension_numbers = #tpu.dot_dimension_numbers<[1], [0], [0], [1], [0, 0, 1, 1], [], []>} : vector<8x8xbf16>, vector<8x128xbf16>, vector<8x128xf32> -> vector<8x128xf32>
    %64 = arith.addf %41, %63 : vector<8x128xf32>
    %65 = vector.extract_strided_slice %38 {offsets = [0, 8], sizes = [8, 8], strides = [1, 1]} : vector<8x384xf32> to vector<8x8xf32>
    %66 = arith.truncf %65 : vector<8x8xf32> to vector<8x8xbf16>
    %67 = vector.extract_strided_slice %38 {offsets = [0, 136], sizes = [8, 8], strides = [1, 1]} : vector<8x384xf32> to vector<8x8xf32>
    %68 = arith.truncf %67 : vector<8x8xf32> to vector<8x8xbf16>
    %69 = vector.extract_strided_slice %38 {offsets = [0, 264], sizes = [8, 8], strides = [1, 1]} : vector<8x384xf32> to vector<8x8xf32>
    %70 = arith.truncf %69 : vector<8x8xf32> to vector<8x8xbf16>
    "tpu.trace_start"() <{level = 10 : i32, message = "qd,kd->qk"}> : () -> ()
    %cst_26 = arith.constant dense<0.000000e+00> : vector<8x8xf32>
    %71 = tpu.matmul %66, %68, %cst_26 {dimension_numbers = #tpu.dot_dimension_numbers<[1], [1], [0], [0], [0, 0, 1, 0], [], []>} : vector<8x8xbf16>, vector<8x8xbf16>, vector<8x8xf32> -> vector<8x8xf32>
    "tpu.trace_stop"() : () -> ()
    %cst_27 = arith.constant dense<0xFF800000> : vector<8xf32>
    %72 = vector.multi_reduction <maximumf>, %71, %cst_27 [1] : vector<8x8xf32> to vector<8xf32>
    %73 = vector.shape_cast %72 : vector<8xf32> to vector<8x1xf32>
    %74 = vector.broadcast %73 : vector<8x1xf32> to vector<8x8xf32>
    %75 = arith.subf %71, %74 : vector<8x8xf32>
    %76 = math.exp %75 : vector<8x8xf32>
    %cst_28 = arith.constant dense<0.000000e+00> : vector<8xf32>
    %77 = vector.multi_reduction <add>, %76, %cst_28 [1] : vector<8x8xf32> to vector<8xf32>
    %78 = vector.shape_cast %77 : vector<8xf32> to vector<8x1xf32>
    %79 = tpu.reciprocal %78 {approx = true} : vector<8x1xf32> -> vector<8x1xf32>
    %80 = vector.broadcast %79 : vector<8x1xf32> to vector<8x8xf32>
    %81 = arith.mulf %76, %80 : vector<8x8xf32>
    %82 = arith.truncf %81 : vector<8x8xf32> to vector<8x8xbf16>
    "tpu.trace_start"() <{level = 10 : i32, message = "qk,kd->qd"}> : () -> ()
    %cst_29 = arith.constant dense<0.000000e+00> : vector<8x8xf32>
    %83 = tpu.matmul %82, %70, %cst_29 {dimension_numbers = #tpu.dot_dimension_numbers<[1], [0], [0], [1], [0, 0, 1, 1], [], []>} : vector<8x8xbf16>, vector<8x8xbf16>, vector<8x8xf32> -> vector<8x8xf32>
    "tpu.trace_stop"() : () -> ()
    %84 = arith.truncf %83 : vector<8x8xf32> to vector<8x8xbf16>
    %85 = vector.extract_strided_slice %40 {offsets = [8, 0], sizes = [8, 128], strides = [1, 1]} : vector<32x128xbf16> to vector<8x128xbf16>
    %cst_30 = arith.constant dense<0.000000e+00> : vector<8x128xf32>
    %86 = tpu.matmul %84, %85, %cst_30 {dimension_numbers = #tpu.dot_dimension_numbers<[1], [0], [0], [1], [0, 0, 1, 1], [], []>} : vector<8x8xbf16>, vector<8x128xbf16>, vector<8x128xf32> -> vector<8x128xf32>
    %87 = arith.addf %64, %86 : vector<8x128xf32>
    %88 = vector.extract_strided_slice %38 {offsets = [0, 16], sizes = [8, 8], strides = [1, 1]} : vector<8x384xf32> to vector<8x8xf32>
    %89 = arith.truncf %88 : vector<8x8xf32> to vector<8x8xbf16>
    %90 = vector.extract_strided_slice %38 {offsets = [0, 144], sizes = [8, 8], strides = [1, 1]} : vector<8x384xf32> to vector<8x8xf32>
    %91 = arith.truncf %90 : vector<8x8xf32> to vector<8x8xbf16>
    %92 = vector.extract_strided_slice %38 {offsets = [0, 272], sizes = [8, 8], strides = [1, 1]} : vector<8x384xf32> to vector<8x8xf32>
    %93 = arith.truncf %92 : vector<8x8xf32> to vector<8x8xbf16>
    "tpu.trace_start"() <{level = 10 : i32, message = "qd,kd->qk"}> : () -> ()
    %cst_31 = arith.constant dense<0.000000e+00> : vector<8x8xf32>
    %94 = tpu.matmul %89, %91, %cst_31 {dimension_numbers = #tpu.dot_dimension_numbers<[1], [1], [0], [0], [0, 0, 1, 0], [], []>} : vector<8x8xbf16>, vector<8x8xbf16>, vector<8x8xf32> -> vector<8x8xf32>
    "tpu.trace_stop"() : () -> ()
    %cst_32 = arith.constant dense<0xFF800000> : vector<8xf32>
    %95 = vector.multi_reduction <maximumf>, %94, %cst_32 [1] : vector<8x8xf32> to vector<8xf32>
    %96 = vector.shape_cast %95 : vector<8xf32> to vector<8x1xf32>
    %97 = vector.broadcast %96 : vector<8x1xf32> to vector<8x8xf32>
    %98 = arith.subf %94, %97 : vector<8x8xf32>
    %99 = math.exp %98 : vector<8x8xf32>
    %cst_33 = arith.constant dense<0.000000e+00> : vector<8xf32>
    %100 = vector.multi_reduction <add>, %99, %cst_33 [1] : vector<8x8xf32> to vector<8xf32>
    %101 = vector.shape_cast %100 : vector<8xf32> to vector<8x1xf32>
    %102 = tpu.reciprocal %101 {approx = true} : vector<8x1xf32> -> vector<8x1xf32>
    %103 = vector.broadcast %102 : vector<8x1xf32> to vector<8x8xf32>
    %104 = arith.mulf %99, %103 : vector<8x8xf32>
    %105 = arith.truncf %104 : vector<8x8xf32> to vector<8x8xbf16>
    "tpu.trace_start"() <{level = 10 : i32, message = "qk,kd->qd"}> : () -> ()
    %cst_34 = arith.constant dense<0.000000e+00> : vector<8x8xf32>
    %106 = tpu.matmul %105, %93, %cst_34 {dimension_numbers = #tpu.dot_dimension_numbers<[1], [0], [0], [1], [0, 0, 1, 1], [], []>} : vector<8x8xbf16>, vector<8x8xbf16>, vector<8x8xf32> -> vector<8x8xf32>
    "tpu.trace_stop"() : () -> ()
    %107 = arith.truncf %106 : vector<8x8xf32> to vector<8x8xbf16>
    %108 = vector.extract_strided_slice %40 {offsets = [16, 0], sizes = [8, 128], strides = [1, 1]} : vector<32x128xbf16> to vector<8x128xbf16>
    %cst_35 = arith.constant dense<0.000000e+00> : vector<8x128xf32>
    %109 = tpu.matmul %107, %108, %cst_35 {dimension_numbers = #tpu.dot_dimension_numbers<[1], [0], [0], [1], [0, 0, 1, 1], [], []>} : vector<8x8xbf16>, vector<8x128xbf16>, vector<8x128xf32> -> vector<8x128xf32>
    %110 = arith.addf %87, %109 : vector<8x128xf32>
    %111 = vector.extract_strided_slice %38 {offsets = [0, 24], sizes = [8, 8], strides = [1, 1]} : vector<8x384xf32> to vector<8x8xf32>
    %112 = arith.truncf %111 : vector<8x8xf32> to vector<8x8xbf16>
    %113 = vector.extract_strided_slice %38 {offsets = [0, 152], sizes = [8, 8], strides = [1, 1]} : vector<8x384xf32> to vector<8x8xf32>
    %114 = arith.truncf %113 : vector<8x8xf32> to vector<8x8xbf16>
    %115 = vector.extract_strided_slice %38 {offsets = [0, 280], sizes = [8, 8], strides = [1, 1]} : vector<8x384xf32> to vector<8x8xf32>
    %116 = arith.truncf %115 : vector<8x8xf32> to vector<8x8xbf16>
    "tpu.trace_start"() <{level = 10 : i32, message = "qd,kd->qk"}> : () -> ()
    %cst_36 = arith.constant dense<0.000000e+00> : vector<8x8xf32>
    %117 = tpu.matmul %112, %114, %cst_36 {dimension_numbers = #tpu.dot_dimension_numbers<[1], [1], [0], [0], [0, 0, 1, 0], [], []>} : vector<8x8xbf16>, vector<8x8xbf16>, vector<8x8xf32> -> vector<8x8xf32>
    "tpu.trace_stop"() : () -> ()
    %cst_37 = arith.constant dense<0xFF800000> : vector<8xf32>
    %118 = vector.multi_reduction <maximumf>, %117, %cst_37 [1] : vector<8x8xf32> to vector<8xf32>
    %119 = vector.shape_cast %118 : vector<8xf32> to vector<8x1xf32>
    %120 = vector.broadcast %119 : vector<8x1xf32> to vector<8x8xf32>
    %121 = arith.subf %117, %120 : vector<8x8xf32>
    %122 = math.exp %121 : vector<8x8xf32>
    %cst_38 = arith.constant dense<0.000000e+00> : vector<8xf32>
    %123 = vector.multi_reduction <add>, %122, %cst_38 [1] : vector<8x8xf32> to vector<8xf32>
    %124 = vector.shape_cast %123 : vector<8xf32> to vector<8x1xf32>
    %125 = tpu.reciprocal %124 {approx = true} : vector<8x1xf32> -> vector<8x1xf32>
    %126 = vector.broadcast %125 : vector<8x1xf32> to vector<8x8xf32>
    %127 = arith.mulf %122, %126 : vector<8x8xf32>
    %128 = arith.truncf %127 : vector<8x8xf32> to vector<8x8xbf16>
    "tpu.trace_start"() <{level = 10 : i32, message = "qk,kd->qd"}> : () -> ()
    %cst_39 = arith.constant dense<0.000000e+00> : vector<8x8xf32>
    %129 = tpu.matmul %128, %116, %cst_39 {dimension_numbers = #tpu.dot_dimension_numbers<[1], [0], [0], [1], [0, 0, 1, 1], [], []>} : vector<8x8xbf16>, vector<8x8xbf16>, vector<8x8xf32> -> vector<8x8xf32>
    "tpu.trace_stop"() : () -> ()
    %130 = arith.truncf %129 : vector<8x8xf32> to vector<8x8xbf16>
    %131 = vector.extract_strided_slice %40 {offsets = [24, 0], sizes = [8, 128], strides = [1, 1]} : vector<32x128xbf16> to vector<8x128xbf16>
    %cst_40 = arith.constant dense<0.000000e+00> : vector<8x128xf32>
    %132 = tpu.matmul %130, %131, %cst_40 {dimension_numbers = #tpu.dot_dimension_numbers<[1], [0], [0], [1], [0, 0, 1, 1], [], []>} : vector<8x8xbf16>, vector<8x128xbf16>, vector<8x128xf32> -> vector<8x128xf32>
    %133 = arith.addf %110, %132 : vector<8x128xf32>
    %134 = arith.addf %3, %133 : vector<8x128xf32>
    %c0_41 = arith.constant 0 : index
    %c0_42 = arith.constant 0 : index
    %c0_43 = arith.constant 0 : index
    %135 = vector.load %arg7[%c0_41, %c0_42, %c0_43] : memref<1x1x128xf32, #tpu.memory_space<vmem>>, vector<1x1x128xf32>
    %136 = vector.shape_cast %135 : vector<1x1x128xf32> to vector<1x128xf32>
    %137 = vector.broadcast %136 : vector<1x128xf32> to vector<8x128xf32>
    %138 = arith.addf %134, %137 : vector<8x128xf32>
    %c0_44 = arith.constant 0 : index
    %c0_45 = arith.constant 0 : index
    %c0_46 = arith.constant 0 : index
    %139 = vector.load %arg8[%c0_44, %c0_45, %c0_46] : memref<1x1x128xf32, #tpu.memory_space<vmem>>, vector<1x1x128xf32>
    %140 = vector.shape_cast %139 : vector<1x1x128xf32> to vector<1x128xf32>
    %c0_47 = arith.constant 0 : index
    %c0_48 = arith.constant 0 : index
    %c0_49 = arith.constant 0 : index
    %141 = vector.load %arg9[%c0_47, %c0_48, %c0_49] : memref<1x1x128xf32, #tpu.memory_space<vmem>>, vector<1x1x128xf32>
    %142 = vector.shape_cast %141 : vector<1x1x128xf32> to vector<1x128xf32>
    %cst_50 = arith.constant dense<0.000000e+00> : vector<8xf32>
    %143 = vector.multi_reduction <add>, %138, %cst_50 [1] : vector<8x128xf32> to vector<8xf32>
    %144 = vector.shape_cast %143 : vector<8xf32> to vector<8x1xf32>
    %cst_51 = arith.constant 3.125000e-02 : f32
    %145 = vector.broadcast %cst_51 : f32 to vector<8x1xf32>
    %146 = arith.mulf %144, %145 : vector<8x1xf32>
    %147 = vector.broadcast %146 : vector<8x1xf32> to vector<8x128xf32>
    %148 = arith.subf %138, %147 : vector<8x128xf32>
    %cst_52 = arith.constant 0.000000e+00 : f32
    %149 = vector.shape_cast %6 : vector<1x128xi1> to vector<1x128xi1>
    %150 = vector.broadcast %149 : vector<1x128xi1> to vector<8x128xi1>
    %151 = vector.broadcast %cst_52 : f32 to vector<8x128xf32>
    %152 = arith.select %150, %148, %151 : vector<8x128xi1>, vector<8x128xf32>
    %153 = arith.mulf %152, %152 : vector<8x128xf32>
    %cst_53 = arith.constant dense<0.000000e+00> : vector<8xf32>
    %154 = vector.multi_reduction <add>, %153, %cst_53 [1] : vector<8x128xf32> to vector<8xf32>
    %155 = vector.shape_cast %154 : vector<8xf32> to vector<8x1xf32>
    %cst_54 = arith.constant 3.125000e-02 : f32
    %156 = vector.broadcast %cst_54 : f32 to vector<8x1xf32>
    %157 = arith.mulf %155, %156 : vector<8x1xf32>
    %cst_55 = arith.constant 9.99999974E-6 : f32
    %158 = vector.broadcast %cst_55 : f32 to vector<8x1xf32>
    %159 = arith.addf %157, %158 : vector<8x1xf32>
    %160 = math.rsqrt %159 : vector<8x1xf32>
    %161 = vector.broadcast %160 : vector<8x1xf32> to vector<8x128xf32>
    %162 = arith.mulf %152, %161 : vector<8x128xf32>
    %163 = vector.broadcast %140 : vector<1x128xf32> to vector<8x128xf32>
    %164 = arith.mulf %162, %163 : vector<8x128xf32>
    %165 = vector.broadcast %142 : vector<1x128xf32> to vector<8x128xf32>
    %166 = arith.addf %164, %165 : vector<8x128xf32>
    %167 = arith.truncf %166 : vector<8x128xf32> to vector<8x128xbf16>
    %c0_56 = arith.constant 0 : index
    %c0_57 = arith.constant 0 : index
    %c0_58 = arith.constant 0 : index
    %168 = vector.load %arg10[%c0_56, %c0_57, %c0_58] : memref<1x128x128xbf16, #tpu.memory_space<vmem>>, vector<1x128x128xbf16>
    %169 = vector.shape_cast %168 : vector<1x128x128xbf16> to vector<128x128xbf16>
    %cst_59 = arith.constant dense<0.000000e+00> : vector<8x128xf32>
    %170 = tpu.matmul %167, %169, %cst_59 {dimension_numbers = #tpu.dot_dimension_numbers<[1], [0], [0], [1], [0, 0, 1, 1], [], []>} : vector<8x128xbf16>, vector<128x128xbf16>, vector<8x128xf32> -> vector<8x128xf32>
    %c0_60 = arith.constant 0 : index
    %c0_61 = arith.constant 0 : index
    %c0_62 = arith.constant 0 : index
    %171 = vector.load %arg11[%c0_60, %c0_61, %c0_62] : memref<1x1x128xf32, #tpu.memory_space<vmem>>, vector<1x1x128xf32>
    %172 = vector.shape_cast %171 : vector<1x1x128xf32> to vector<1x128xf32>
    %173 = vector.broadcast %172 : vector<1x128xf32> to vector<8x128xf32>
    %174 = arith.addf %170, %173 : vector<8x128xf32>
    %cst_63 = arith.constant 5.000000e-01 : f32
    %175 = vector.broadcast %cst_63 : f32 to vector<8x128xf32>
    %176 = arith.mulf %175, %174 : vector<8x128xf32>
    %cst_64 = arith.constant 4.471500e-02 : f32
    %177 = vector.broadcast %cst_64 : f32 to vector<8x128xf32>
    %178 = arith.mulf %177, %174 : vector<8x128xf32>
    %179 = arith.mulf %178, %174 : vector<8x128xf32>
    %180 = arith.mulf %179, %174 : vector<8x128xf32>
    %181 = arith.addf %174, %180 : vector<8x128xf32>
    %cst_65 = arith.constant 0.797884583 : f32
    %182 = vector.broadcast %cst_65 : f32 to vector<8x128xf32>
    %183 = arith.mulf %182, %181 : vector<8x128xf32>
    %184 = math.tanh %183 : vector<8x128xf32>
    %cst_66 = arith.constant 1.000000e+00 : f32
    %185 = vector.broadcast %cst_66 : f32 to vector<8x128xf32>
    %186 = arith.addf %185, %184 : vector<8x128xf32>
    %187 = arith.mulf %176, %186 : vector<8x128xf32>
    %188 = arith.truncf %187 : vector<8x128xf32> to vector<8x128xbf16>
    %c0_67 = arith.constant 0 : index
    %c0_68 = arith.constant 0 : index
    %c0_69 = arith.constant 0 : index
    %189 = vector.load %arg12[%c0_67, %c0_68, %c0_69] : memref<1x128x128xbf16, #tpu.memory_space<vmem>>, vector<1x128x128xbf16>
    %190 = vector.shape_cast %189 : vector<1x128x128xbf16> to vector<128x128xbf16>
    %cst_70 = arith.constant dense<0.000000e+00> : vector<8x128xf32>
    %191 = tpu.matmul %188, %190, %cst_70 {dimension_numbers = #tpu.dot_dimension_numbers<[1], [0], [0], [1], [0, 0, 1, 1], [], []>} : vector<8x128xbf16>, vector<128x128xbf16>, vector<8x128xf32> -> vector<8x128xf32>
    %c0_71 = arith.constant 0 : index
    %c0_72 = arith.constant 0 : index
    %c0_73 = arith.constant 0 : index
    %192 = vector.load %arg13[%c0_71, %c0_72, %c0_73] : memref<1x1x128xf32, #tpu.memory_space<vmem>>, vector<1x1x128xf32>
    %193 = vector.shape_cast %192 : vector<1x1x128xf32> to vector<1x128xf32>
    %194 = vector.broadcast %193 : vector<1x128xf32> to vector<8x128xf32>
    %195 = arith.addf %191, %194 : vector<8x128xf32>
    %196 = arith.addf %138, %195 : vector<8x128xf32>
    %c0_74 = arith.constant 0 : index
    %c0_75 = arith.constant 0 : index
    %197 = vector.load %arg15[%c0_74, %c0_75] : memref<8x128xf32, #tpu.memory_space<vmem>>, vector<8x128xf32>
    tpu.vector_store %arg15[%c0_74, %c0_75], %196 {strides = array<i32>} : memref<8x128xf32, #tpu.memory_space<vmem>>, vector<8x128xf32>,
    %c0_76 = arith.constant 0 : index
    %c0_77 = arith.constant 0 : index
    %c0_78 = arith.constant 0 : index
    %198 = vector.load %arg14[%c0_76, %c0_77, %c0_78] : memref<1x8x128xf32, #tpu.memory_space<vmem>>, vector<1x8x128xf32>
    %199 = vector.shape_cast %198 : vector<1x8x128xf32> to vector<8x128xf32>
    %200 = vector.shape_cast %196 : vector<8x128xf32> to vector<1x8x128xf32>
    tpu.vector_store %arg14[%c0_76, %c0_77, %c0_78], %200 {strides = array<i32>} : memref<1x8x128xf32, #tpu.memory_space<vmem>>, vector<1x8x128xf32>,
    return
  }
  func.func @transform_0(%arg0: i32, %arg1: i32) -> (i32, i32, i32) {
    %c0_i32 = arith.constant 0 : i32
    %c0_i32_0 = arith.constant 0 : i32
    %c0_i32_1 = arith.constant 0 : i32
    return %arg0, %c0_i32, %c0_i32_0 : i32, i32, i32
  }
  func.func @transform_1(%arg0: i32, %arg1: i32) -> (i32, i32, i32) {
    %c0_i32 = arith.constant 0 : i32
    %c0_i32_0 = arith.constant 0 : i32
    %c0_i32_1 = arith.constant 0 : i32
    return %arg1, %c0_i32, %c0_i32_0 : i32, i32, i32
  }
  func.func @transform_2(%arg0: i32, %arg1: i32) -> (i32, i32, i32) {
    %c0_i32 = arith.constant 0 : i32
    %c0_i32_0 = arith.constant 0 : i32
    %c0_i32_1 = arith.constant 0 : i32
    return %arg1, %c0_i32, %c0_i32_0 : i32, i32, i32
  }
  func.func @transform_3(%arg0: i32, %arg1: i32) -> (i32, i32, i32) {
    %c0_i32 = arith.constant 0 : i32
    %c0_i32_0 = arith.constant 0 : i32
    %c0_i32_1 = arith.constant 0 : i32
    return %arg1, %c0_i32, %c0_i32_0 : i32, i32, i32
  }
  func.func @transform_4(%arg0: i32, %arg1: i32) -> (i32, i32, i32) {
    %c0_i32 = arith.constant 0 : i32
    %c0_i32_0 = arith.constant 0 : i32
    %c0_i32_1 = arith.constant 0 : i32
    return %arg1, %c0_i32, %c0_i32_0 : i32, i32, i32
  }
  func.func @transform_5(%arg0: i32, %arg1: i32) -> (i32, i32, i32) {
    %c0_i32 = arith.constant 0 : i32
    %c0_i32_0 = arith.constant 0 : i32
    %c0_i32_1 = arith.constant 0 : i32
    return %arg1, %c0_i32, %c0_i32_0 : i32, i32, i32
  }
  func.func @transform_6(%arg0: i32, %arg1: i32) -> (i32, i32, i32) {
    %c0_i32 = arith.constant 0 : i32
    %c0_i32_0 = arith.constant 0 : i32
    %c0_i32_1 = arith.constant 0 : i32
    return %arg1, %c0_i32, %c0_i32_0 : i32, i32, i32
  }
  func.func @transform_7(%arg0: i32, %arg1: i32) -> (i32, i32, i32) {
    %c0_i32 = arith.constant 0 : i32
    %c0_i32_0 = arith.constant 0 : i32
    %c0_i32_1 = arith.constant 0 : i32
    return %arg1, %c0_i32, %c0_i32_0 : i32, i32, i32
  }
  func.func @transform_8(%arg0: i32, %arg1: i32) -> (i32, i32, i32) {
    %c0_i32 = arith.constant 0 : i32
    %c0_i32_0 = arith.constant 0 : i32
    %c0_i32_1 = arith.constant 0 : i32
    return %arg1, %c0_i32, %c0_i32_0 : i32, i32, i32
  }
  func.func @transform_9(%arg0: i32, %arg1: i32) -> (i32, i32, i32) {
    %c0_i32 = arith.constant 0 : i32
    %c0_i32_0 = arith.constant 0 : i32
    %c0_i32_1 = arith.constant 0 : i32
    return %arg1, %c0_i32, %c0_i32_0 : i32, i32, i32
  }
  func.func @transform_10(%arg0: i32, %arg1: i32) -> (i32, i32, i32) {
    %c0_i32 = arith.constant 0 : i32
    %c0_i32_0 = arith.constant 0 : i32
    %c0_i32_1 = arith.constant 0 : i32
    return %arg1, %c0_i32, %c0_i32_0 : i32, i32, i32
  }
  func.func @transform_11(%arg0: i32, %arg1: i32) -> (i32, i32, i32) {
    %c0_i32 = arith.constant 0 : i32
    %c0_i32_0 = arith.constant 0 : i32
    %c0_i32_1 = arith.constant 0 : i32
    return %arg1, %c0_i32, %c0_i32_0 : i32, i32, i32
  }
  func.func @transform_12(%arg0: i32, %arg1: i32) -> (i32, i32, i32) {
    %c0_i32 = arith.constant 0 : i32
    %c0_i32_0 = arith.constant 0 : i32
    %c0_i32_1 = arith.constant 0 : i32
    return %arg0, %c0_i32, %c0_i32_0 : i32, i32, i32
  }
}

</mosaic_0001>

<bundles_post_ra>
// kernel: tpu_custom_call.1
= control target key start
LH: loop header
LB: loop body
LE: loop exit
PB: predicated region body
PF: predicated region fallthrough
CT: control target
= control target key end

     0   :  { %s3669_s0 = inlined_call_operand.hbm [shape: f32[2,8,128], index: 0, kind: input, shape index: {}]   ;;  %s3670_s1 = inlined_call_operand.vmem [shape: f32[2,1,128], index: 1, kind: input, shape index: {}]   ;;  %s3671_s2 = inlined_call_operand.vmem [shape: f32[2,1,128], index: 2, kind: input, shape index: {}]   ;;  %s3672_s3 = inlined_call_operand.hbm [shape: bf16[2,128,384], index: 3, kind: input, shape index: {}]   ;;  %s3673_s4 = inlined_call_operand.hbm [shape: bf16[2,32,128], index: 4, kind: input, shape index: {}]   ;;  %s3674_s5 = inlined_call_operand.vmem [shape: f32[2,1,128], index: 5, kind: input, shape index: {}]   ;;  %s3675_s6 = inlined_call_operand.vmem [shape: f32[2,1,128], index: 6, kind: input, shape index: {}]   ;;  %s3676_s7 = inlined_call_operand.vmem [shape: f32[2,1,128], index: 7, kind: input, shape index: {}]   ;;  %s3677_s8 = inlined_call_operand.hbm [shape: bf16[2,128,128], index: 8, kind: input, shape index: {}]   ;;  %s3678_s9 = inlined_call_operand.vmem [shape: f32[2,1,128], index: 9, kind: input, shape index: {}]   ;;  %s3679_s10 = inlined_call_operand.hbm [shape: bf16[2,128,128], index: 10, kind: input, shape index: {}]   ;;  %s3680_s11 = inlined_call_operand.vmem [shape: f32[2,1,128], index: 11, kind: input, shape index: {}]   ;;  %s3681_s12 = inlined_call_operand.hbm [shape: f32[2,8,128], index: 12, kind: output, shape index: {}]  }
   0x1   :  { %3715 = sst [smem:[#allocation36_spill]] %s3669_s0 }
   0x2   :  { %3716 = sst [smem:[#allocation37_spill]] %s3670_s1 }
   0x3   :  { %3717 = sst [smem:[#allocation38_spill]] %s3671_s2 }
   0x4   :  { %3718 = sst [smem:[#allocation39_spill]] %s3672_s3 }
   0x5   :  { %3719 = sst [smem:[#allocation40_spill]] %s3673_s4 }
   0x6   :  { %3720 = sst [smem:[#allocation41_spill]] %s3674_s5 }
   0x7   :  { %3721 = sst [smem:[#allocation42_spill]] %s3675_s6 }
   0x8   :  { %3722 = sst [smem:[#allocation43_spill]] %s3676_s7 }
   0x9   :  { %3723 = sst [smem:[#allocation44_spill]] %s3677_s8 }
   0xa   :  { %3724 = sst [smem:[#allocation45_spill]] %s3678_s9 }
   0xb   :  { %3725 = sst [smem:[#allocation46_spill]] %s3679_s10 }
   0xc   :  { %3726 = sst [smem:[#allocation47_spill]] %s3680_s11 }
   0xd   :  { %3727 = sst [smem:[#allocation48_spill]] %s3681_s12 }
   0xe   :  { %17 = vsyncpa [#allocation4], 0 }
   0xf   :  { %19 = vsyncpa [#allocation4 + $0x1], 0 }
  0x10   :  { %20 = vsyncpa [#allocation7], 0 }
  0x11   :  { %22 = vsyncpa [#allocation7 + $0x1], 0 }
  0x12   :  { %23 = vsyncpa [#allocation10], 0 }
  0x13   :  { %25 = vsyncpa [#allocation10 + $0x1], 0 }
  0x14   :  { %26 = vsyncpa [#allocation5], 0 }
  0x15   :  { %28 = vsyncpa [#allocation5 + $0x1], 0  ;;  %s2969_s21 = smov 0   ;;  %s2971_s22 = smov 0  }
  0x16   :  { %s2973_s23 = smov 0   ;;  %s2975_s24 = smov 0  }
  0x17   :  { %s2977_s25 = smov 0   ;;  %s2979_s26 = smov 0  }
  0x18   :  { %s2981_s27 = smov 0   ;;  %s2983_s28 = smov 0  }
  0x19   :  { %s2985_s29 = smov 0   ;;  %s2987_s30 = smov 0  }
  0x1a   :  { %s2989_s13 = smov 0  }
  0x1b LB: > { %3728 = sst [smem:[#allocation17_spill]] %s2850_s22  ;;  %p3684_p0 = scmp.eq.s32.totalorder %s2886_s13, 0  ;;  %s2886_s13 = sphi %s2989_s13, %s34_s13   ;;  %s2882_s30 = sphi %s2987_s30, %s3812_s30   ;;  %s2878_s29 = sphi %s2985_s29, %s3811_s29   ;;  %s2874_s28 = sphi %s2983_s28, %s3810_s28   ;;  %s2870_s27 = sphi %s2981_s27, %s3809_s27   ;;  %s2866_s26 = sphi %s2979_s26, %s3808_s26   ;;  %s2862_s25 = sphi %s2977_s25, %s3807_s25   ;;  %s2858_s24 = sphi %s2975_s24, %s3806_s24   ;;  %s2854_s23 = sphi %s2973_s23, %s3805_s23   ;;  %s2850_s22 = sphi %s2971_s22, %s3804_s22   ;;  %s2846_s21 = sphi %s2969_s21, %s3803_s21  }
  0x1c   : > { %3729 = sst [smem:[#allocation18_spill]] %s2854_s23  ;;  %p138_p1 = scmp.ne.s32.totalorder %s2854_s23, %s2850_s22 }
  0x1d   : > { %3730 = sst [smem:[#allocation19_spill]] %s2858_s24  ;;  %p3683_p2 = scmp.lt.s32.totalorder %s2886_s13, 4 }
  0x1e   : > { %3731 = sst [smem:[#allocation20_spill]] %s2862_s25  ;;  %p140_p3 = por %p138_p1, %p3684_p0 }
  0x1f   : > { %3732 = sst [smem:[#allocation21_spill]] %s2866_s26  ;;  %s3033_s16 = sand.u32 1, %s2854_s23  }
  0x20   : > { %3733 = sst [smem:[#allocation22_spill]] %s2870_s27  ;;  %s2402_s17 = smul.u32 3072, %s2878_s29 }
  0x21   : > { %3734 = sst [smem:[#allocation23_spill]] %s2874_s28  ;;  %s2401_s18 = smul.u32 192, %s3033_s16 }
  0x22   : > { %3735 = sst [smem:[#allocation24_spill]] %s2878_s29  ;;  %p3039_p4 = pnand %p3683_p2, %p140_p3 }
  0x23   : > { %3736 = sst [smem:[#allocation25_spill]] %s2882_s30  ;;  %s3739_s3 = sld [smem:[#allocation39_spill]] }
  0x24   : > { %3737 = sst [smem:[#allocation26_spill]] %s2886_s13  ;;  %s436_s15 = scalar_lea.vmem [#allocation6], %s2401_s18 }
  0x25   : > { %s3738_s19 = scalar_select %p3039_p4, 1, 0 }
  0x26   : > { %s443_s28 = sshll.u32 %s436_s15, 4  ;;  %s3740_s11 = sand.u32 1, %s2886_s13   ;;  %s3048_s28 = int_to_ptr.vmem [resolvable:$true] %s443_s28 }
  0x27   : > { %s3053_s9 = scalar_lea.sflag [#allocation7], %s3740_s11  ;;  %p3059_p7 = pneg %p3039_p4 }
  0x29   : > { %s3046_s14 = scalar_lea.hbm %s3739_s3, %s2402_s17  ;;  %s2611_s15 = scalar_lea.hbm %s3739_s3, 6144 }
  0x2a   : > { %s2606_s7 = scalar_lea.hbm %s3046_s14, 3072  ;;  %p2612_p10 = scmp.lt.u32.totalorder %s3046_s14, %s3739_s3 }
  0x2b   : > { %p2607_p6 = scmp.ne.s32.totalorder %s3046_s14, %s2606_s7  ;;  %p2613_p11 = scmp.lt.u32.totalorder %s2611_s15, %s2606_s7 }
  0x2c   : > { %p2615_p13 = scmp.lt.u32.totalorder %s2606_s7, %s3046_s14 }
  0x2d   : > { %p2609_p8 = pnand %p3059_p7, %p2607_p6  ;;  %p2614_p12 = por %p2613_p11, %p2612_p10 }
  0x2f   : > { %p2610_p9 = pneg %p2609_p8  ;;  %p2616_p1 = por %p2615_p13, %p2614_p12 }
  0x31   : > { %p2617_p3 = pnand %p2616_p1, %p2610_p9 }
  0x33   : > { %2620 = shalt.err (!%p2617_p3)
}
  0x34   : > { %s2621_s11 = scalar_lea.vmem %s3048_s28, 3072  ;;  %s2888_s17 = smov [#allocation6]  }
  0x35   : > { %p2622_p6 = scmp.ne.s32.totalorder %s3048_s28, %s2621_s11  ;;  %s2626_s18 = sshll.u32 %s2888_s17, 4  ;;  %s2627_s18 = int_to_ptr.vmem [resolvable:$false] %s2626_s18 }
  0x36   : > { %s2628_s6 = scalar_lea.vmem %s2627_s18, 6144  ;;  %p2629_p0 = scmp.lt.s32.totalorder %s3048_s28, %s2627_s18 }
  0x37   : > { %p2624_p8 = pnand %p2622_p6, %p3059_p7  ;;  %p2630_p5 = scmp.lt.s32.totalorder %s2628_s6, %s2621_s11 }
  0x39   : > { %p2625_p2 = pneg %p2624_p8  ;;  %p2631_p10 = por %p2630_p5, %p2629_p0 }
  0x3b   : > { %p2632_p11 = pnand %p2631_p10, %p2625_p2 }
  0x3d   : > { %2635 = shalt.err (!%p2632_p11)
}
  0x3e   : > { %s2889_s7 = smov 192   ;;  %s2890_s15 = smov 12  }
  0x3f   : > { %2422 = dma.hbm_to_vmem [thread:$0]  (!%p3039_p4), %s3046_s14, 3072, %s3048_s28, %s3053_s9, %s2889_s7, %s2889_s7, %s2890_s15  }
  0x40   : > { %p544_p9 = scmp.lt.s32.totalorder %s2886_s13, 5  ;;  %p3742_p0 = scmp.ge.s32.totalorder %s2886_s13, 1 }
  0x41   : > { %s2139_s11 = sshll.u32 %s3033_s16, 6  ;;  %s3685_s17 = sshll.u32 %s2878_s29, 10 }
  0x42   : > { %p3086_p2 = pnand %p3742_p0, %p544_p9  ;;  %s3744_s8 = sld [smem:[#allocation44_spill]] }
  0x43   : > { %s496_s28 = scalar_lea.vmem [#allocation9], %s2139_s11  ;;  %s3745_s7 = sand.u32 1, %s2886_s13  }
  0x44   : > { %s3743_s20 = scalar_select %p3086_p2, 1, 0 }
  0x45   : > { %s503_s14 = sshll.u32 %s496_s28, 4  ;;  %s3105_s15 = scalar_lea.sflag [#allocation10], %s3745_s7  ;;  %s3101_s14 = int_to_ptr.vmem [resolvable:$true] %s503_s14 }
  0x48   : > { %s3097_s3 = scalar_lea.hbm %s3744_s8, %s3685_s17  ;;  %s2641_s17 = scalar_lea.hbm %s3744_s8, 2048 }
  0x49   : > { %s2636_s5 = scalar_lea.hbm %s3097_s3, 1024  ;;  %p2642_p1 = scmp.lt.u32.totalorder %s3097_s3, %s3744_s8 }
  0x4a   : > { %p2637_p5 = scmp.ne.s32.totalorder %s3097_s3, %s2636_s5  ;;  %p2643_p3 = scmp.lt.u32.totalorder %s2641_s17, %s2636_s5 }
  0x4b   : > { %p2645_p8 = scmp.lt.u32.totalorder %s2636_s5, %s3097_s3 }
  0x4c   : > { %p2639_p12 = pnand %p2637_p5, %p3059_p7  ;;  %p2644_p6 = por %p2643_p3, %p2642_p1 }
  0x4e   : > { %p2640_p13 = pneg %p2639_p12  ;;  %p2646_p10 = por %p2645_p8, %p2644_p6 }
  0x50   : > { %p2647_p11 = pnand %p2646_p10, %p2640_p13 }
  0x52   : > { %2650 = shalt.err (!%p2647_p11)
}
  0x53   : > { %s2651_s28 = scalar_lea.vmem %s3101_s14, 1024  ;;  %s2891_s7 = smov [#allocation9]  }
  0x54   : > { %p2652_p9 = scmp.ne.s32.totalorder %s3101_s14, %s2651_s28  ;;  %s2656_s18 = sshll.u32 %s2891_s7, 4  ;;  %s2657_s18 = int_to_ptr.vmem [resolvable:$false] %s2656_s18 }
  0x55   : > { %s2658_s1 = scalar_lea.vmem %s2657_s18, 2048  ;;  %p2659_p12 = scmp.lt.s32.totalorder %s3101_s14, %s2657_s18 }
  0x56   : > { %p2654_p0 = pnand %p2652_p9, %p3059_p7  ;;  %p2660_p2 = scmp.lt.s32.totalorder %s2658_s1, %s2651_s28 }
  0x58   : > { %p2655_p5 = pneg %p2654_p0  ;;  %p2661_p1 = por %p2660_p2, %p2659_p12 }
  0x5a   : > { %p2662_p3 = pnand %p2661_p1, %p2655_p5 }
  0x5c   : > { %2665 = shalt.err (!%p2662_p3)
}
  0x5d   : > { %s3686_s2 = smov 64   ;;  %s3688_s5 = smov 4  }
  0x5e   : > { %2428 = dma.hbm_to_vmem [thread:$0]  (!%p3039_p4), %s3097_s3, 1024, %s3101_s14, %s3105_s15, %s3686_s2, %s3686_s2, %s3688_s5  }
  0x5f   : > { %s3746_s17 = sshll.u32 %s2878_s29, 10  ;;  %s3747_s10 = sld [smem:[#allocation46_spill]] }
  0x60   : > { %s523_s18 = scalar_lea.vmem [#allocation11], %s2139_s11  ;;  %s3144_s8 = sadd.s32 4294967295, %s2886_s13  }
  0x61   : > { %s530_s1 = sshll.u32 %s523_s18, 4  ;;  %3748 = sst [smem:[#allocation27_spill]] %s3144_s8  ;;  %s3141_s1 = int_to_ptr.vmem [resolvable:$true] %s530_s1 }
  0x62   : > { %s2130_s3 = sadd.s32 4294967294, %s2886_s13   ;;  %s43_s14 = sadd.s32 1, %s2878_s29 }
  0x63   : > { %p44_p2 = scmp.ge.s32.totalorder %s43_s14, 2  ;;  %s46_s6 = sadd.s32 1, %s2882_s30 }
  0x64   : > { %p60_p13 = scmp.ne.s32.totalorder %s2866_s26, %s2862_s25  ;;  %p3750_p6 = scmp.eq.s32.totalorder %s2886_s13, 0 }
  0x65   : > { %s3137_s7 = scalar_lea.hbm %s3747_s10, %s3746_s17  ;;  %s53_s17 = sadd.s32 1, %s2866_s26 }
  0x66   : > { %s3814_s14 = smov (%p44_p2, %s43_s14), 0  ;;  %s3816_s6 = smov (!%p44_p2, %s46_s6), %s2882_s30 }
  0x67   : > { %3749 = sst [smem:[#allocation28_spill]] %s3814_s14  ;;  %p3160_p8 = por %p3750_p6, %p60_p13 }
  0x68   : > { %p66_p10 = scmp.ne.s32.totalorder %s2862_s25, %s2858_s24  ;;  %p48_p11 = scmp.ge.s32.totalorder %s3816_s6, 2 }
  0x69   : > { %p67_p9 = scmp.eq.s32.totalorder %s3144_s8, 0  ;;  %s128_s28 = ssub.s32 %s2878_s29, %s3814_s14 }
  0x6a   : > { %p144_p0 = scmp.ne.s32.totalorder %s2850_s22, %s2846_s21  ;;  %s3818_s6 = smov (%p48_p11, %s3816_s6), 0 }
  0x6b   : > { %3752 = sst [smem:[#allocation29_spill]] %s3818_s6  ;;  %p3176_p5 = por %p67_p9, %p66_p10 }
  0x6c   : > { %p129_p12 = scmp.eq.s32.totalorder %s128_s28, 0  ;;  %s50_s2 = ssub.s32 %s2882_s30, %s3818_s6 }
  0x6d   : > { %s3753_s18 = scalar_select %p3176_p5, 1, 0 }
  0x6e   : > { %p3182_p1 = por %p144_p0, %p67_p9  ;;  %p51_p3 = scmp.eq.s32.totalorder %s50_s2, 0 }
  0x6f   : > { %3754 = sst [smem:[#allocation30_spill]] %s3753_s18  ;;  %p376_p2 = scmp.eq.s32.totalorder %s3144_s8, 3 }
  0x70   : > { %s3755_s5 = scalar_select %p3182_p1, 1, 0 }
  0x71   : > { %s3757_s21 = sadd.s32 1, %s2854_s23  ;;  %p3198_p6 = por %p376_p2, %p60_p13 }
  0x72   : > { %3756 = sst [smem:[#allocation31_spill]] %s3755_s5  ;;  %p382_p11 = scmp.eq.s32.totalorder %s2130_s3, 3 }
  0x73   : > { %s3190_s14 = scalar_select %p129_p12, %s2854_s23, %s3757_s21  }
  0x74   : > { %s3193_s27 = scalar_select %p51_p3, %s2866_s26, %s53_s17  }
  0x75   : > { %3758 = sst [smem:[#allocation32_spill]] %s3190_s14  ;;  %s402_s28 = sand.u32 1, %s2866_s26  }
  0x76   : > { %3759 = sst [smem:[#allocation33_spill]] %s3193_s27  ;;  %s2134_s6 = sshll.u32 %s2882_s30, 7 }
  0x77   : > { %s3760_s22 = scalar_select %p3198_p6, 1, 0 }
  0x78   : > { %p3207_p9 = por %p382_p11, %p66_p10  ;;  %s2133_s2 = sshll.u32 %s402_s28, 3 }
  0x79   : > { %3761 = sst [smem:[#allocation34_spill]] %s3760_s22  ;;  %s3764_s0 = sld [smem:[#allocation36_spill]] }
  0x7a   : > { %s3762_s18 = scalar_select %p3207_p9, 1, 0 }
  0x7b   : > { %p3765_p0 = scmp.lt.s32.totalorder %s2886_s13, 4  ;;  %s406_s17 = scalar_lea.vmem [#allocation3], %s2133_s2 }
  0x7c   : > { %3763 = sst [smem:[#allocation35_spill]] %s3762_s18  ;;  %s413_s30 = sshll.u32 %s406_s17, 4  ;;  %s3225_s30 = int_to_ptr.vmem [resolvable:$true] %s413_s30 }
  0x7d   : > { %p3220_p13 = pnand %p3765_p0, %p3160_p8  ;;  %s2136_s27 = sshll.u32 %s3033_s16, 4 }
  0x7e   : > { %s403_s8 = scalar_lea.sflag [#allocation4], %s402_s28 }
  0x7f   : > { %s3214_s21 = scalar_lea.hbm %s3764_s0, %s2134_s6  ;;  %p2668_p12 = pneg %p3220_p13 }
  0x80   : > { %s2666_s5 = scalar_lea.hbm %s3214_s21, 128  ;;  %s2671_s26 = scalar_lea.hbm %s3764_s0, 256 }
  0x81   : > { %p2667_p10 = scmp.ne.s32.totalorder %s3214_s21, %s2666_s5  ;;  %p2672_p8 = scmp.lt.u32.totalorder %s3214_s21, %s3764_s0 }
  0x82   : > { %p2673_p11 = scmp.lt.u32.totalorder %s2671_s26, %s2666_s5  ;;  %p2675_p9 = scmp.lt.u32.totalorder %s2666_s5, %s3214_s21 }
  0x83   : > { %p2669_p3 = pnand %p2668_p12, %p2667_p10 }
  0x84   : > { %p2674_p0 = por %p2673_p11, %p2672_p8 }
  0x85   : > { %p2670_p2 = pneg %p2669_p3 }
  0x86   : > { %p2676_p6 = por %p2675_p9, %p2674_p0 }
  0x88   : > { %p2677_p1 = pnand %p2676_p6, %p2670_p2 }
  0x8a   : > { %2680 = shalt.err (!%p2677_p1)
}
  0x8b   : > { %s2681_s28 = scalar_lea.vmem %s3225_s30, 128  ;;  %s2894_s2 = smov [#allocation3]  }
  0x8c   : > { %p2682_p10 = scmp.ne.s32.totalorder %s3225_s30, %s2681_s28  ;;  %s2686_s17 = sshll.u32 %s2894_s2, 4  ;;  %s2687_s17 = int_to_ptr.vmem [resolvable:$false] %s2686_s17 }
  0x8d   : > { %s2688_s23 = scalar_lea.vmem %s2687_s17, 256  ;;  %p2689_p4 = scmp.lt.s32.totalorder %s3225_s30, %s2687_s17 }
  0x8e   : > { %p2684_p3 = pnand %p2682_p10, %p2668_p12  ;;  %p2690_p8 = scmp.lt.s32.totalorder %s2688_s23, %s2681_s28 }
  0x90   : > { %p2685_p5 = pneg %p2684_p3  ;;  %p2691_p11 = por %p2690_p8, %p2689_p4 }
  0x92   : > { %p2692_p9 = pnand %p2691_p11, %p2685_p5 }
  0x94   : > { %2695 = shalt.err (!%p2692_p9)
}
  0x95   : > { %2419 = dma.hbm_to_vmem [thread:$0]  (!%p3220_p13), %s3214_s21, 128, %s3225_s30, %s403_s8  }
  0x96   : > { %s2215_s26 = sshll.u32 %s2878_s29, 8  ;;  %s3767_s4 = sld [smem:[#allocation40_spill]] }
  0x97   : > { %s457_s11 = scalar_lea.vmem [#allocation8], %s2136_s27 }
  0x98   : > { %s464_s28 = sshll.u32 %s457_s11, 4  ;;  %s3260_s28 = int_to_ptr.vmem [resolvable:$true] %s464_s28 }
  0x9c   : > { %s3256_s6 = scalar_lea.hbm %s3767_s4, %s2215_s26  ;;  %s2701_s8 = scalar_lea.hbm %s3767_s4, 512 }
  0x9d   : > { %s2696_s3 = scalar_lea.hbm %s3256_s6, 256  ;;  %p2702_p6 = scmp.lt.u32.totalorder %s3256_s6, %s3767_s4 }
  0x9e   : > { %p2697_p4 = scmp.ne.s32.totalorder %s3256_s6, %s2696_s3  ;;  %p2703_p13 = scmp.lt.u32.totalorder %s2701_s8, %s2696_s3 }
  0x9f   : > { %p2705_p2 = scmp.lt.u32.totalorder %s2696_s3, %s3256_s6 }
  0xa0   : > { %p2699_p5 = pnand %p2697_p4, %p3059_p7  ;;  %p2704_p12 = por %p2703_p13, %p2702_p6 }
  0xa2   : > { %p2700_p1 = pneg %p2699_p5  ;;  %p2706_p0 = por %p2705_p2, %p2704_p12 }
  0xa4   : > { %p2707_p10 = pnand %p2706_p0, %p2700_p1 }
  0xa6   : > { %2710 = shalt.err (!%p2707_p10)
}
  0xa7   : > { %s2711_s27 = scalar_lea.vmem %s3260_s28, 256  ;;  %s2895_s16 = smov [#allocation8]  }
  0xa8   : > { %p2712_p3 = scmp.ne.s32.totalorder %s3260_s28, %s2711_s27  ;;  %s2716_s23 = sshll.u32 %s2895_s16, 4  ;;  %s2717_s23 = int_to_ptr.vmem [resolvable:$false] %s2716_s23 }
  0xa9   : > { %s2718_s26 = scalar_lea.vmem %s2717_s23, 512  ;;  %p2719_p9 = scmp.lt.s32.totalorder %s3260_s28, %s2717_s23 }
  0xaa   : > { %p2714_p8 = pnand %p2712_p3, %p3059_p7  ;;  %p2720_p4 = scmp.lt.s32.totalorder %s2718_s26, %s2711_s27 }
  0xac   : > { %p2715_p11 = pneg %p2714_p8  ;;  %p2721_p5 = por %p2720_p4, %p2719_p9 }
  0xae   : > { %p2722_p6 = pnand %p2721_p5, %p2715_p11 }
  0xb0   : > { %2725 = shalt.err (!%p2722_p6)
}
  0xb1   : > { %p3768_p1 = scmp.ne.s32.totalorder %s3738_s19, 0  ;;  %s3769_s14 = smov 4  }
  0xb2   : > { %s3770_s5 = smov 64   ;;  %s2726_s11 = scalar_lea.hbm %s3137_s7, 1024 }
  0xb3   : > { %2425 = dma.hbm_to_vmem [thread:$0]  (!%p3768_p1), %s3256_s6, 256, %s3260_s28, %s3053_s9, %s3770_s5, %s3770_s5, %s3769_s14  }
  0xb4   : > { %p2727_p13 = scmp.ne.s32.totalorder %s3137_s7, %s2726_s11  ;;  %s2731_s21 = scalar_lea.hbm %s3747_s10, 2048 }
  0xb5   : > { %p2732_p0 = scmp.lt.u32.totalorder %s3137_s7, %s3747_s10  ;;  %p2733_p10 = scmp.lt.u32.totalorder %s2731_s21, %s2726_s11 }
  0xb6   : > { %p2729_p12 = pnand %p2727_p13, %p3059_p7  ;;  %p2735_p8 = scmp.lt.u32.totalorder %s2726_s11, %s3137_s7 }
  0xb7   : > { %p2734_p3 = por %p2733_p10, %p2732_p0 }
  0xb8   : > { %p2730_p2 = pneg %p2729_p12 }
  0xb9   : > { %p2736_p11 = por %p2735_p8, %p2734_p3 }
  0xbb   : > { %p2737_p9 = pnand %p2736_p11, %p2730_p2 }
  0xbd   : > { %2740 = shalt.err (!%p2737_p9)
}
  0xbe   : > { %s2741_s9 = scalar_lea.vmem %s3141_s1, 1024  ;;  %s2896_s6 = smov [#allocation11]  }
  0xbf   : > { %p2742_p4 = scmp.ne.s32.totalorder %s3141_s1, %s2741_s9  ;;  %s2746_s28 = sshll.u32 %s2896_s6, 4  ;;  %s2747_s28 = int_to_ptr.vmem [resolvable:$false] %s2746_s28 }
  0xc0   : > { %s2748_s17 = scalar_lea.vmem %s2747_s28, 2048  ;;  %p2749_p13 = scmp.lt.s32.totalorder %s3141_s1, %s2747_s28 }
  0xc1   : > { %p2744_p5 = pnand %p2742_p4, %p3059_p7  ;;  %p2750_p12 = scmp.lt.s32.totalorder %s2748_s17, %s2741_s9 }
  0xc3   : > { %p2745_p6 = pneg %p2744_p5  ;;  %p2751_p0 = por %p2750_p12, %p2749_p13 }
  0xc5   : > { %p2752_p10 = pnand %p2751_p0, %p2745_p6 }
  0xc7   : > { %2755 = shalt.err (!%p2752_p10)
}
  0xc8   : > { %2431 = dma.hbm_to_vmem [thread:$0]  (!%p3768_p1), %s3137_s7, 1024, %s3141_s1, %s3105_s15, %s3770_s5, %s3770_s5, %s3769_s14  }
  0xc9   : > { %p3771_p7 = scmp.ne.s32.totalorder %s3743_s20, 0 }
  0xca   : > { %s3772_s12 = sld [smem:[#allocation30_spill]] (!%p3771_p7)  ;;  %s3315_s27 = sand.u32 (!%p3771_p7), 1, %s2862_s25  }
  0xcb   : > { %548 = sbr.rel (%p3771_p7) target bundleno = 3926 (0xf56), region = 68  ;;  %s2146_s16 = sshll.u32 (!%p3771_p7), %s3315_s27, 3 }
  0xcc   : > { %s551_s23 = scalar_lea.sflag (!%p3771_p7), [#allocation4], %s3315_s27  ;;  %s554_s26 = scalar_lea.vmem (!%p3771_p7), [#allocation3], %s2146_s16 }
  0xd0   : > { %p3773_p2 = scmp.ne.s32.totalorder (!%p3771_p7), %s3772_s12, 0 }
  0xd2   : > { %2829 = dma.done.wait (%p3773_p2), %s551_s23, 128  }
  0xd3   : > { %2831 = vsyncadd (%p3773_p2), %s551_s23, 4294967168  ;;  %s3774_s19 = sld [smem:[#allocation27_spill]]  ;;  %s3775_s11 = sld [smem:[#allocation17_spill]] }
  0xd4   : > { %s3776_s15 = sld [smem:[#allocation31_spill]] }
  0xd9   : > { %s559_s7 = sand.u32 1, %s3774_s19   ;;  %s561_s20 = sand.u32 1, %s3775_s11  }
  0xda   : > { %s2403_s1 = smul.u32 192, %s561_s20  ;;  %s560_s14 = scalar_lea.sflag [#allocation7], %s559_s7 }
  0xdb   : > { %p3777_p1 = scmp.ne.s32.totalorder %s3776_s15, 0 }
  0xdc   : > { %s3325_s5 = scalar_lea.vmem [#allocation6], %s2403_s1 }
  0xdd   : > { %2833 = dma.done.wait (%p3777_p1), %s560_s14, 3328  }
  0xde   : > { %2835 = vsyncadd (%p3777_p1), %s560_s14, 4294963968  ;;  %s2147_s3 = sshll.u32 %s561_s20, 4  ;;  %s2148_s30 = sshll.u32 %s561_s20, 6 }
  0xdf   : > { %s3331_s21 = scalar_lea.vmem [#allocation8], %s2147_s3  ;;  %s578_s8 = scalar_lea.sflag [#allocation10], %s559_s7 }
  0xe0   : > { %s3333_s2 = scalar_lea.vmem [#allocation9], %s2148_s30 }
  0xe1   : > { %2837 = dma.done.wait (%p3777_p1), %s578_s8, 2048  }
  0xe2   : > { %2839 = vsyncadd (%p3777_p1), %s578_s8, 4294965248  ;;  %s3778_s9 = sld [smem:[#allocation22_spill]]  ;;  %s3780_s15 = sld [smem:[#allocation38_spill]] }
  0xe3   : > { %s3781_s14 = sld [smem:[#allocation41_spill]]  ;;  %s3782_s4 = sld [smem:[#allocation42_spill]] }
  0xe4   : > { %s3783_s29 = sld [smem:[#allocation43_spill]]  ;;  %s3784_s13 = sld [smem:[#allocation45_spill]] }
  0xe5   : > { %s3785_s19 = sld [smem:[#allocation47_spill]]  ;;  %s3373_s20 = scalar_lea.vmem [#allocation12], %s2146_s16 }
  0xe8   : > { %p672_p3 = scmp.lt.s32.totalorder %s3778_s9, 1  ;;  %p2151_p8 = scmp.ne.s32.totalorder %s3778_s9, 0 }
  0xe9   : > { %v698_v0 = vld [vmem:[%s554_s26] sm:$0xff] (!%p2151_p8) }
  0xea   : > { %s3341_s6 = scalar_select %p672_p3, %s3778_s9, 1 }
  0xeb   : > { %697 = sbr.rel (%p2151_p8) target bundleno = 242 (0xf2), region = 92  ;;  %699 = vst [vmem:[#allocation2] sm:$0xff] (!%p2151_p8), %v698_v0 }
  0xec   : > { %s677_s7 = scalar_lea.vmem %s3780_s15, %s3341_s6  ;;  %s680_s3 = scalar_lea.vmem %s3781_s14, %s3341_s6 }
  0xed   : > { %s683_s10 = scalar_lea.vmem %s3782_s4, %s3341_s6  ;;  %s686_s25 = scalar_lea.vmem %s3783_s29, %s3341_s6 }
  0xee   : > { %s689_s12 = scalar_lea.vmem %s3784_s13, %s3341_s6  ;;  %s692_s11 = scalar_lea.vmem %s3785_s19, %s3341_s6 }
  0xef   : > { %s3371_s15 = scalar_lea.vmem [#allocation11], %s2148_s30 }
  0xf2 PF: > { %v3376_v1 = vld [vmem:[#allocation2] sm:$0xff]  ;;  %v2536_v2 = vld [vmem:[%s3325_s5 + $0x4] ss:$12 sps:$4 sm:$0xff]   ;;  %v2897_v4 = vmov 0.0   ;;  %v2544_v9 = vld [vmem:[%s3325_s5 + $0x34] ss:$12 sps:$4 sm:$0xff]   ;;  %v701_v10 = vlaneseq }
  0xf3   : > { %706 = vadd.xlane.f32.xlu0 %v3376_v1  ;;  %v2538_v3 = vld [vmem:[%s3325_s5] ss:$12 sps:$4 sm:$0xff]   ;;  %2269 = vmatprep.subr.bf16.mxu1 %v2897_v4  ;;  %v2539_v5 = vld [vmem:[%s3325_s5 + $0x8] ss:$12 sps:$4 sm:$0xff]   ;;  %v2542_v7 = vld [vmem:[%s3325_s5 + $0x18] ss:$12 sps:$4 sm:$0xff]  }
  0xf4   : > { %v2540_v6 = vld [vmem:[%s3325_s5 + $0x1c] ss:$12 sps:$4 sm:$0xff]   ;;  %895 = vmatprep.subr.bf16.mxu0 %v2536_v2  ;;  %2270 = vmatpush3.bf16.msra.mxu1 %v2539_v5  ;;  %v2543_v8 = vld [vmem:[%s3325_s5 + $0x20] ss:$12 sps:$4 sm:$0xff]   ;;  %v3389_v11 = vand.u32 127, %v701_v10  ;;  %v2898_v29 = vmov 0  }
  0xf5   : > { %896 = vmatpush1.bf16.msra.mxu0 %v2538_v3  ;;  %2271 = vmatprep.subr.bf16.mxu1 %v2897_v4  ;;  %v2546_v17 = vld [vmem:[%s3325_s5 + $0x30] ss:$12 sps:$4 sm:$0xff]   ;;  %v2547_v18 = vld [vmem:[%s3325_s5 + $0x38] ss:$12 sps:$4 sm:$0xff]   ;;  %v2550_v20 = vld [vmem:[%s3325_s5 + $0x48] ss:$12 sps:$4 sm:$0xff]  }
  0xf6   : > { %897 = vmatprep.subr.bf16.mxu0 %v2540_v6  ;;  %vm703_vm0 = vcmp.lt.s32.totalorder %v3389_v11, 32  ;;  %v2548_v19 = vld [vmem:[%s3325_s5 + $0x4c] ss:$12 sps:$4 sm:$0xff]   ;;  %v2551_v21 = vld [vmem:[%s3325_s5 + $0x50] ss:$12 sps:$4 sm:$0xff]   ;;  %927 = vmatprep.mubr.bf16.mxu0 %v2898_v29  ;;  %vm2899_vm1 = vmmov 0  }
  0xf7   : > { %v2552_v22 = vld [vmem:[%s3325_s5 + $0x64] ss:$12 sps:$4 sm:$0xff]   ;;  %v2554_v23 = vld [vmem:[%s3325_s5 + $0x60] ss:$12 sps:$4 sm:$0xff]   ;;  %v2555_v24 = vld [vmem:[%s3325_s5 + $0x68] ss:$12 sps:$4 sm:$0xff]   ;;  %2285 = vmatprep.mubr.msk.bf16.mxu1 %vm2899_vm1, %v2897_v4 }
  0xf8   : > { %2272 = vmatpush3.bf16.msra.mxu1 %v2543_v8  ;;  %v2556_v25 = vld [vmem:[%s3325_s5 + $0x7c] ss:$12 sps:$4 sm:$0xff]   ;;  %v2558_v26 = vld [vmem:[%s3325_s5 + $0x78] ss:$12 sps:$4 sm:$0xff]   ;;  %v2559_v27 = vld [vmem:[%s3325_s5 + $0x80] ss:$12 sps:$4 sm:$0xff]  }
  0xf9   : > { %898 = vmatpush1.bf16.msra.mxu0 %v2542_v7  ;;  %2273 = vmatprep.subr.bf16.mxu1 %v2897_v4  ;;  %v2560_v28 = vld [vmem:[%s3325_s5 + $0x94] ss:$12 sps:$4 sm:$0xff]   ;;  %v2562_v30 = vld [vmem:[%s3325_s5 + $0x90] ss:$12 sps:$4 sm:$0xff]   ;;  %v2563_v31 = vld [vmem:[%s3325_s5 + $0x98] ss:$12 sps:$4 sm:$0xff]  }
  0xfa   : > { %899 = vmatprep.subr.bf16.mxu0 %v2544_v9  ;;  %v2564_v32 = vld [vmem:[%s3325_s5 + $0xac] ss:$12 sps:$4 sm:$0xff]   ;;  %v2566_v33 = vld [vmem:[%s3325_s5 + $0xa8] ss:$12 sps:$4 sm:$0xff]   ;;  %v2567_v34 = vld [vmem:[%s3325_s5 + $0xb0] ss:$12 sps:$4 sm:$0xff]  }
  0xfb   : > { %s3786_s22 = sld [smem:[#allocation37_spill]]  ;;  %v2153_v41 = vld [vmem:[%s677_s7] ss:$0 sm:$0xff]  ;;  %vm1045_vm2 = vcmask 1043456   ;;  %vm983_vm3 = vcmask 64512   ;;  %s2900_s16 = smov 120  }
  0xfc   : > { %2274 = vmatpush3.bf16.msra.mxu1 %v2547_v18  ;;  %s2901_s26 = smov 112   ;;  %s2902_s5 = smov 104   ;;  %v2574_v11 = vld [vmem:[%s3333_s2 + $0x30] sm:$0xff]  }
  0xfd   : > { %900 = vmatpush1.bf16.msra.mxu0 %v2546_v17  ;;  %2275 = vmatprep.subr.bf16.mxu1 %v2897_v4  ;;  %s3793_s28 = sld [smem:[#allocation23_spill]]  ;;  %s1899_s4 = sshll.u32 %s3373_s20, 4  ;;  %s3607_s4 = int_to_ptr.vmem [resolvable:$true] %s1899_s4 }
  0xfe   : > { %901 = vmatprep.subr.bf16.mxu0 %v2548_v19  ;;  %s3796_s29 = sld [smem:[#allocation48_spill]] }
 0x100   : > { %2276 = vmatpush3.bf16.msra.mxu1 %v2551_v21 }
 0x101   : > { %902 = vmatpush1.bf16.msra.mxu0 %v2550_v20  ;;  %2277 = vmatprep.subr.bf16.mxu1 %v2897_v4  ;;  %s3787_s24 = scalar_lea.vmem %s3786_s22, %s3341_s6  ;;  %s1886_s6 = scalar_lea.sflag [#allocation5], %s3315_s27 }
 0x102   : > { %903 = vmatprep.subr.bf16.mxu0 %v2552_v22  ;;  %v2152_v39 = vld [vmem:[%s3787_s24] ss:$0 sm:$0xff] }
 0x103   : > { %s2212_s0 = sshll.u32 %s3793_s28, 7 }
 0x104   : > { %2278 = vmatpush3.bf16.msra.mxu1 %v2555_v24  ;;  %v977_v24 = vld [vmem:[%s3331_s21 + $0x4] sm:$0xf]  ;;  %s3797_s18 = smov %s3796_s29  ;;  %s3605_s13 = scalar_lea.hbm %s3796_s29, %s2212_s0 }
 0x105   : > { %904 = vmatpush1.bf16.msra.mxu0 %v2554_v23  ;;  %2279 = vmatprep.subr.bf16.mxu1 %v2897_v4 }
 0x106   : > { %905 = vmatprep.subr.bf16.mxu0 %v2556_v25  ;;  %v1208_v25 = vsel %vm1045_vm2, %v977_v24, 0 }
 0x108   : > { %2280 = vmatpush3.bf16.msra.mxu1 %v2559_v27 }
 0x109   : > { %906 = vmatpush1.bf16.msra.mxu0 %v2558_v26  ;;  %2281 = vmatprep.subr.bf16.mxu1 %v2897_v4 }
 0x10a   : > { %907 = vmatprep.subr.bf16.mxu0 %v2560_v28 }
 0x10c   : > { %2282 = vmatpush3.bf16.msra.mxu1 %v2563_v31 }
 0x10d   : > { %908 = vmatpush1.bf16.msra.mxu0 %v2562_v30  ;;  %2283 = vmatprep.subr.bf16.mxu1 %v2897_v4  ;;  %v976_v30 = vld [vmem:[%s3331_s21] sm:$0xf] }
 0x10e   : > { %909 = vmatprep.subr.bf16.mxu0 %v2564_v32 }
 0x110   : > { %2284 = vmatpush3.bf16.msra.mxu1 %v2567_v34 }
 0x111   : > { %910 = vmatpush1.bf16.msra.mxu0 %v2566_v33  ;;  %2295 = vmatprep.subr.bf16.mxu1 %v2897_v4  ;;  %v1254_v33 = vsel %vm1045_vm2, %v976_v30, 0 }
 0x112   : > { %2289 = vmatprep.subr.bf16.mxu0 %v2897_v4 }
 0x180   : > { %v707_v12 = vpop.xlane.xlu0 %706 }
 0x181   : > { %v708_v13 = vmul.f32 0.03125, %v707_v12 }
 0x183   : > { %v709_v14 = vsub.f32 %v3376_v1, %v708_v13 }
 0x185   : > { %v712_v15 = vsel %vm703_vm0, %v709_v14, 0.0 }
 0x186   : > { %v713_v16 = vmul.f32 %v712_v15, %v712_v15 }
 0x188   : > { %714 = vadd.xlane.f32.xlu0 %v713_v16 }
 0x215   : > { %v715_v35 = vpop.xlane.xlu0 %714 }
 0x216   : > { %v716_v36 = vmul.f32 0.03125, %v715_v35 }
 0x218   : > { %v717_v37 = vadd.f32 1e-05, %v716_v36 }
 0x21a   : > { %2584 = vrsqrt.f32 %v717_v37 }
 0x224   : > { %v2585_v38 = vpop.eup %2584 }
 0x225   : > { %v719_v40 = vmul.f32 %v2585_v38, %v712_v15 }
 0x227   : > { %v726_v42 = vmul.f32 %v2152_v39, %v719_v40 }
 0x229   : > { %v733_v43 = vadd.f32 %v2153_v41, %v726_v42 }
 0x22b   : > { %v734_v44 = vpack.c.bf16 %v733_v43, %v733_v43 }
 0x22d   : > { %928 = vmatmul.mubr.bf16.vlgmr.msra.gmra.mrb[0].mxu0 %v734_v44  ;;  %2286 = vmatmul.mubr.bf16.vlgmr.msra.gmra.mrb[0].mxu1 %v734_v44 }
 0x22e   : > { %2291 = vmatprep.mubr.msk.bf16.mxu0 %vm2899_vm1, %v2897_v4  ;;  %2297 = vmatprep.mubr.msk.bf16.mxu1 %vm2899_vm1, %v2897_v4 }
 0x300   : > { %v929_v45 = vpop.f32.mrb[0].mxu0  ;;  %v970_v46 = vpop.f32.mrb[0].mxu1 }
 0x301   : > { %v3435_v47 = vpack.c.bf16 %v970_v46, %v970_v46  ;;  %v931_v48 = vpop.f32.mrb[1].mxu0  ;;  %v2287_v49 = vpop.f32.mrb[1].mxu1  ;;  %v3446_v57 = vpack.c.bf16 %v929_v45, %v929_v45 }
 0x302   : > { %v3437_v50 = vpack.c.bf16 %v931_v48, %v931_v48  ;;  %v933_v51 = vpop.f32.mrb[2].mxu0  ;;  %v973_v52 = vpop.f32.mrb[2].mxu1 }
 0x303   : > { %v934_v53 = vpop.f32.mrb[3].mxu0  ;;  %v2288_v54 = vpop.f32.mrb[3].mxu1  ;;  %v1047_v55 = vsel %vm1045_vm2, %v3435_v47, 0 }
 0x304   : > { %2296 = vmatpush3.bf16.msra.mxu1 %v1047_v55  ;;  %1094 = vrot.lane.b32.xlu1 %v3437_v50, %s2900_s16  ;;  %v988_v56 = vsel %vm983_vm3, %v3437_v50, 0 }
 0x305   : > { %2290 = vmatpush3.bf16.xpose.msra.mxu0 %v988_v56  ;;  %2307 = vmatprep.subr.bf16.mxu1 %v2897_v4 }
 0x306   : > { %2301 = vmatprep.subr.bf16.mxu0 %v2897_v4 }
 0x308   : > { %1091 = vrot.lane.b32.xlu1 %v3446_v57, %s2900_s16 }
 0x30c   : > { %2292 = vmatmul.mubr.msk.bf16.vlgmr.msra.gmra.mrb[4].mxu0 %vm983_vm3, %v3446_v57 }
 0x30d   : > { %2303 = vmatprep.mubr.msk.bf16.mxu0 %vm2899_vm1, %v2897_v4 }
 0x376   : > { %v1095_v58 = vpop.permute.xlu1 %1094 }
 0x377   : > { %v1100_v59 = vsel %vm983_vm3, %v1095_v58, 0 }
 0x378   : > { %2302 = vmatpush3.bf16.xpose.msra.mxu0 %v1100_v59 }
 0x379   : > { %2313 = vmatprep.subr.bf16.mxu0 %v2897_v4 }
 0x37a   : > { %v1092_v60 = vpop.permute.xlu1 %1091 }
 0x37f   : > { %2304 = vmatmul.mubr.msk.bf16.vlgmr.msra.gmra.mrb[8].mxu0 %vm983_vm3, %v1092_v60 }
 0x380   : > { %2315 = vmatprep.mubr.msk.bf16.mxu0 %vm2899_vm1, %v2897_v4  ;;  %2314 = vmatpush3.bf16.msra.mxu0 %v1208_v25 }
 0x381   : > { %2325 = vmatprep.subr.bf16.mxu0 %v2897_v4 }
 0x3df   : > { %v1024_v61 = vpop.f32.mrb[4].mxu0 }
 0x3e0   : > { %v2293_v62 = vpop.f32.mrb[5].mxu0  ;;  %v1030_v63 = vsel %vm983_vm3, %v1024_v61, -inf }
 0x3e1   : > { %1031 = vmax.xlane.f32.xlu0 %v1030_v63  ;;  %v1027_v0 = vpop.f32.mrb[6].mxu0 }
 0x3e2   : > { %v2294_v2 = vpop.f32.mrb[7].mxu0 }
 0x452   : > { %v1136_v3 = vpop.f32.mrb[8].mxu0 }
 0x453   : > { %v2305_v5 = vpop.f32.mrb[9].mxu0  ;;  %v1142_v6 = vsel %vm983_vm3, %v1136_v3, -inf }
 0x454   : > { %1143 = vmax.xlane.f32.xlu1 %v1142_v6  ;;  %v1139_v7 = vpop.f32.mrb[10].mxu0 }
 0x455   : > { %v2306_v8 = vpop.f32.mrb[11].mxu0 }
 0x465   : > { %1296 = vrot.lane.b32.xlu1 %v3446_v57, %s2901_s26 }
 0x46e   : > { %v1032_v9 = vpop.xlane.xlu0 %1031 }
 0x46f   : > { %v1033_v10 = vsub.f32 %v1024_v61, %v1032_v9 }
 0x471   : > { %v1034_v12 = vmul.f32 1.442695, %v1033_v10 }
 0x473   : > { %2586 = vpow2.f32 %v1034_v12 }
 0x47d   : > { %v2587_v13 = vpop.eup %2586 }
 0x47e   : > { %v1036_v14 = vsel %vm983_vm3, %v2587_v13, 0.0 }
 0x47f   : > { %1037 = vadd.xlane.f32.xlu0 %v1036_v14 }
 0x4e1   : > { %v1144_v15 = vpop.xlane.xlu1 %1143 }
 0x4e2   : > { %v1145_v16 = vsub.f32 %v1136_v3, %v1144_v15 }
 0x4e4   : > { %v1146_v17 = vmul.f32 1.442695, %v1145_v16 }
 0x4e5   : > { %v1297_v46 = vpop.permute.xlu1 %1296 }
 0x4e6   : > { %2588 = vpow2.f32 %v1146_v17 }
 0x4f0   : > { %v2589_v18 = vpop.eup %2588 }
 0x4f1   : > { %v1148_v19 = vsel %vm983_vm3, %v2589_v18, 0.0 }
 0x4f2   : > { %1149 = vadd.xlane.f32.xlu0 %v1148_v19 }
 0x508   : > { %1155 = vrot.lane.b32.xlu0 %v3435_v47, %s2900_s16  ;;  %s2903_s16 = smov [#allocation12]  }
 0x50c   : > { %v1038_v20 = vpop.xlane.xlu0 %1037  ;;  %1298 = vrot.lane.b32.xlu0 %v3437_v50, %s2901_s26 }
 0x50d   : > { %2590 = vrcp.f32 %v1038_v20 }
 0x517   : > { %v2591_v21 = vpop.eup %2590 }
 0x518   : > { %v1040_v22 = vmul.f32 %v2591_v21, %v2587_v13 }
 0x51a   : > { %v1041_v23 = vpack.c.bf16 %v1040_v22, %v1040_v22 }
 0x51c   : > { %2298 = vmatmul.mubr.msk.bf16.vlgmr.msra.gmra.mrb[4].mxu1 %vm983_vm3, %v1041_v23 }
 0x51d   : > { %2309 = vmatprep.mubr.msk.bf16.mxu1 %vm2899_vm1, %v2897_v4 }
 0x57f   : > { %v1150_v26 = vpop.xlane.xlu0 %1149 }
 0x580   : > { %2592 = vrcp.f32 %v1150_v26 }
 0x583   : > { %v1156_v27 = vpop.permute.xlu0 %1155 }
 0x584   : > { %v1161_v28 = vsel %vm1045_vm2, %v1156_v27, 0 }
 0x585   : > { %2308 = vmatpush3.bf16.msra.mxu1 %v1161_v28 }
 0x586   : > { %2319 = vmatprep.subr.bf16.mxu1 %v2897_v4 }
 0x587   : > { %v1299_v39 = vpop.permute.xlu0 %1298 }
 0x588   : > { %v1304_v44 = vsel %vm983_vm3, %v1299_v39, 0 }
 0x58a   : > { %v2593_v29 = vpop.eup %2592 }
 0x58b   : > { %v1152_v31 = vmul.f32 %v2593_v29, %v2589_v18 }
 0x58d   : > { %v1153_v32 = vpack.c.bf16 %v1152_v31, %v1152_v31 }
 0x58f   : > { %2310 = vmatmul.mubr.msk.bf16.vlgmr.msra.gmra.mrb[8].mxu1 %vm983_vm3, %v1153_v32 }
 0x590   : > { %2320 = vmatpush3.bf16.msra.mxu1 %v1254_v33  ;;  %2321 = vmatprep.mubr.msk.bf16.mxu1 %vm2899_vm1, %v2897_v4 }
 0x591   : > { %2331 = vmatprep.subr.bf16.mxu1 %v2897_v4 }
 0x5ef   : > { %v1083_v34 = vpop.f32.mrb[4].mxu1 }
 0x5f0   : > { %v1089_v35 = vpack.c.bf16 %v1083_v34, %v1083_v34  ;;  %v2299_v36 = vpop.f32.mrb[5].mxu1  ;;  %v979_v34 = vld [vmem:[%s3331_s21 + $0xc] sm:$0xf] }
 0x5f1   : > { %v1086_v37 = vpop.f32.mrb[6].mxu1 }
 0x5f2   : > { %v2300_v38 = vpop.f32.mrb[7].mxu1  ;;  %2322 = vmatmul.mubr.msk.bf16.vlgmr.msra.gmra.mrb[12].mxu1 %vm983_vm3, %v1089_v35  ;;  %v1569_v35 = vsel %vm1045_vm2, %v979_v34, 0 }
 0x5f3   : > { %2333 = vmatprep.mubr.msk.bf16.mxu1 %vm2899_vm1, %v2897_v4 }
 0x662   : > { %v1197_v40 = vpop.f32.mrb[8].mxu1 }
 0x663   : > { %v1203_v41 = vpack.c.bf16 %v1197_v40, %v1197_v40  ;;  %v2311_v42 = vpop.f32.mrb[9].mxu1 }
 0x664   : > { %v1200_v43 = vpop.f32.mrb[10].mxu1 }
 0x665   : > { %v2312_v45 = vpop.f32.mrb[11].mxu1  ;;  %2316 = vmatmul.mubr.msk.bf16.vlgmr.msra.gmra.mrb[12].mxu0 %vm983_vm3, %v1203_v41 }
 0x666   : > { %2326 = vmatpush3.bf16.xpose.msra.mxu0 %v1304_v44  ;;  %2327 = vmatprep.mubr.msk.bf16.mxu0 %vm2899_vm1, %v2897_v4 }
 0x667   : > { %2337 = vmatprep.subr.bf16.mxu0 %v2897_v4 }
 0x66d   : > { %2328 = vmatmul.mubr.msk.bf16.vlgmr.msra.gmra.mrb[16].mxu0 %vm983_vm3, %v1297_v46 }
 0x66e   : > { %2339 = vmatprep.mubr.msk.bf16.mxu0 %vm2899_vm1, %v2897_v4 }
 0x6c5   : > { %v1290_v48 = vpop.f32.mrb[12].mxu1 }
 0x6c6   : > { %v2323_v49 = vpop.f32.mrb[13].mxu1 }
 0x6c7   : > { %v1293_v51 = vpop.f32.mrb[14].mxu1 }
 0x6c8   : > { %v2324_v52 = vpop.f32.mrb[15].mxu1 }
 0x738   : > { %v1244_v53 = vpop.f32.mrb[12].mxu0 }
 0x739   : > { %v3495_v54 = vadd.f32 %v1290_v48, %v1244_v53  ;;  %v2317_v55 = vpop.f32.mrb[13].mxu0 }
 0x73a   : > { %v1247_v56 = vpop.f32.mrb[14].mxu0  ;;  %v2190_v55 = vld [vmem:[%s680_s3] ss:$0 sm:$0xff] }
 0x73b   : > { %v2318_v58 = vpop.f32.mrb[15].mxu0 }
 0x740   : > { %v1340_v59 = vpop.f32.mrb[16].mxu0 }
 0x741   : > { %v2329_v60 = vpop.f32.mrb[17].mxu0  ;;  %v1346_v61 = vsel %vm983_vm3, %v1340_v59, -inf }
 0x742   : > { %1347 = vmax.xlane.f32.xlu0 %v1346_v61  ;;  %v1343_v62 = vpop.f32.mrb[18].mxu0  ;;  %v2568_v60 = vld [vmem:[%s3333_s2] sm:$0xff]   ;;  %v2569_v61 = vld [vmem:[%s3333_s2 + $0x8] sm:$0xff]  }
 0x743   : > { %v2330_v63 = vpop.f32.mrb[19].mxu0 }
 0x758   : > { %1358 = vrot.lane.b32.xlu0 %v3435_v47, %s2901_s26  ;;  %s2760_s26 = sshll.u32 %s2903_s16, 4  ;;  %s2761_s26 = int_to_ptr.vmem [resolvable:$false] %s2760_s26 }
 0x759   : > { %p2763_p6 = scmp.lt.s32.totalorder %s3607_s4, %s2761_s26 }
 0x75c   : > { %1454 = vrot.lane.b32.xlu0 %v3446_v57, %s2902_s5 }
 0x7cf   : > { %v1348_v0 = vpop.xlane.xlu0 %1347 }
 0x7d0   : > { %v1349_v2 = vsub.f32 %v1340_v59, %v1348_v0 }
 0x7d2   : > { %v1350_v3 = vmul.f32 1.442695, %v1349_v2 }
 0x7d3   : > { %v1359_v5 = vpop.permute.xlu0 %1358 }
 0x7d4   : > { %2594 = vpow2.f32 %v1350_v3  ;;  %v1364_v6 = vsel %vm1045_vm2, %v1359_v5, 0  ;;  %v2570_v3 = vld [vmem:[%s3333_s2 + $0x10] sm:$0xff]   ;;  %v2571_v5 = vld [vmem:[%s3333_s2 + $0x18] sm:$0xff]  }
 0x7d5   : > { %2332 = vmatpush3.bf16.msra.mxu1 %v1364_v6  ;;  %v2572_v6 = vld [vmem:[%s3333_s2 + $0x20] sm:$0xff]  }
 0x7d6   : > { %2343 = vmatprep.subr.bf16.mxu1 %v2897_v4 }
 0x7d7   : > { %v1455_v15 = vpop.permute.xlu0 %1454 }
 0x7de   : > { %v2595_v7 = vpop.eup %2594 }
 0x7df   : > { %v1352_v8 = vsel %vm983_vm3, %v2595_v7, 0.0 }
 0x7e0   : > { %1353 = vadd.xlane.f32.xlu1 %v1352_v8  ;;  %v2575_v8 = vld [vmem:[%s3333_s2 + $0x38] sm:$0xff]  }
 0x7f1   : > { %1456 = vrot.lane.b32.xlu1 %v3437_v50, %s2902_s5  ;;  %v978_v50 = vld [vmem:[%s3331_s21 + $0x8] sm:$0xf] }
 0x7f2   : > { %v1411_v16 = vsel %vm1045_vm2, %v978_v50, 0  ;;  %v2192_v50 = vld [vmem:[%s686_s25] ss:$0 sm:$0xff] }
 0x7f3   : > { %2338 = vmatpush3.bf16.msra.mxu0 %v1411_v16 }
 0x7f4   : > { %2349 = vmatprep.subr.bf16.mxu0 %v2897_v4 }
 0x86d   : > { %v1354_v9 = vpop.xlane.xlu1 %1353 }
 0x86e   : > { %2596 = vrcp.f32 %v1354_v9  ;;  %v2576_v9 = vld [vmem:[%s3371_s15] sm:$0xff]  }
 0x871   : > { %v1457_v12 = vpop.permute.xlu1 %1456 }
 0x872   : > { %v1462_v14 = vsel %vm983_vm3, %v1457_v12, 0 }
 0x878   : > { %v2597_v57 = vpop.eup %2596 }
 0x879   : > { %v1356_v10 = vmul.f32 %v2597_v57, %v2595_v7  ;;  %v2573_v7 = vld [vmem:[%s3333_s2 + $0x28] sm:$0xff]  }
 0x87b   : > { %v1357_v13 = vpack.c.bf16 %v1356_v10, %v1356_v10 }
 0x87d   : > { %2334 = vmatmul.mubr.msk.bf16.vlgmr.msra.gmra.mrb[16].mxu1 %vm983_vm3, %v1357_v13 }
 0x87e   : > { %2344 = vmatpush3.bf16.xpose.msra.mxu1 %v1462_v14  ;;  %2345 = vmatprep.mubr.msk.bf16.mxu1 %vm2899_vm1, %v2897_v4  ;;  %v2191_v14 = vld [vmem:[%s683_s10] ss:$0 sm:$0xff] }
 0x87f   : > { %2355 = vmatprep.subr.bf16.mxu1 %v2897_v4 }
 0x885   : > { %2346 = vmatmul.mubr.msk.bf16.vlgmr.msra.gmra.mrb[20].mxu1 %vm983_vm3, %v1455_v15 }
 0x886   : > { %2357 = vmatprep.mubr.msk.bf16.mxu1 %vm2899_vm1, %v2897_v4  ;;  %2356 = vmatpush3.bf16.msra.mxu1 %v1569_v35 }
 0x887   : > { %2381 = vmatprep.subr.bf16.mxu1 %v2897_v4 }
 0x950   : > { %v1400_v17 = vpop.f32.mrb[16].mxu1 }
 0x951   : > { %v1406_v18 = vpack.c.bf16 %v1400_v17, %v1400_v17  ;;  %v2335_v19 = vpop.f32.mrb[17].mxu1 }
 0x952   : > { %v1403_v20 = vpop.f32.mrb[18].mxu1  ;;  %v2577_v19 = vld [vmem:[%s3371_s15 + $0x8] sm:$0xff]  }
 0x953   : > { %v2336_v21 = vpop.f32.mrb[19].mxu1  ;;  %2340 = vmatmul.mubr.msk.bf16.vlgmr.msra.gmra.mrb[20].mxu0 %vm983_vm3, %v1406_v18  ;;  %v2578_v20 = vld [vmem:[%s3371_s15 + $0x10] sm:$0xff]  }
 0x954   : > { %2351 = vmatprep.mubr.msk.bf16.mxu0 %vm2899_vm1, %v2897_v4  ;;  %v2579_v21 = vld [vmem:[%s3371_s15 + $0x18] sm:$0xff]  }
 0x958   : > { %v1498_v22 = vpop.f32.mrb[20].mxu1 }
 0x959   : > { %v2347_v23 = vpop.f32.mrb[21].mxu1  ;;  %v1504_v24 = vsel %vm983_vm3, %v1498_v22, -inf }
 0x95a   : > { %1505 = vmax.xlane.f32.xlu0 %v1504_v24  ;;  %v1501_v25 = vpop.f32.mrb[22].mxu1  ;;  %v2581_v23 = vld [vmem:[%s3371_s15 + $0x28] sm:$0xff]   ;;  %v2582_v24 = vld [vmem:[%s3371_s15 + $0x30] sm:$0xff]  }
 0x95b   : > { %v2348_v26 = vpop.f32.mrb[23].mxu1  ;;  %v2583_v25 = vld [vmem:[%s3371_s15 + $0x38] sm:$0xff]  }
 0x95c   : > { %v2193_v26 = vld [vmem:[%s689_s12] ss:$0 sm:$0xff] }
 0x970   : > { %1516 = vrot.lane.b32.xlu0 %v3435_v47, %s2902_s5  ;;  %s2762_s5 = scalar_lea.vmem %s2761_s26, 256 }
 0x9e7   : > { %v1506_v27 = vpop.xlane.xlu0 %1505 }
 0x9e8   : > { %v1507_v28 = vsub.f32 %v1498_v22, %v1506_v27  ;;  %v2580_v22 = vld [vmem:[%s3371_s15 + $0x20] sm:$0xff]   ;;  %s3795_s15 = sld [smem:[#allocation34_spill]] }
 0x9ea   : > { %v1508_v29 = vmul.f32 1.442695, %v1507_v28 }
 0x9eb   : > { %v1517_v30 = vpop.permute.xlu0 %1516 }
 0x9ec   : > { %2598 = vpow2.f32 %v1508_v29  ;;  %v1522_v31 = vsel %vm1045_vm2, %v1517_v30, 0 }
 0x9ed   : > { %2350 = vmatpush3.bf16.msra.mxu0 %v1522_v31 }
 0x9ee   : > { %2361 = vmatprep.subr.bf16.mxu0 %v2897_v4  ;;  %p3798_p9 = scmp.ne.s32.totalorder %s3795_s15, 0 }
 0x9f6   : > { %v2599_v32 = vpop.eup %2598 }
 0x9f7   : > { %v1510_v33 = vsel %vm983_vm3, %v2599_v32, 0.0 }
 0x9f8   : > { %1511 = vadd.xlane.f32.xlu1 %v1510_v33 }
 0xa26   : > { %v1447_v47 = vpop.f32.mrb[20].mxu0 }
 0xa27   : > { %v1453_v36 = vadd.f32 %v1447_v47, %v3495_v54  ;;  %v2341_v37 = vpop.f32.mrb[21].mxu0 }
 0xa28   : > { %v1450_v38 = vpop.f32.mrb[22].mxu0 }
 0xa29   : > { %v2342_v39 = vpop.f32.mrb[23].mxu0 }
 0xa85   : > { %v1512_v40 = vpop.xlane.xlu1 %1511 }
 0xa86   : > { %2600 = vrcp.f32 %v1512_v40  ;;  %v2202_v40 = vld [vmem:[%s692_s11] ss:$0 sm:$0xff]  ;;  %s2756_s11 = scalar_lea.vmem %s3607_s4, 128 }
 0xa87   : > { %p2757_p11 = scmp.ne.s32.totalorder %s3607_s4, %s2756_s11  ;;  %p2764_p13 = scmp.lt.s32.totalorder %s2762_s5, %s2756_s11 }
 0xa89   : > { %p2758_p4 = pnand %p2757_p11, %p3798_p9  ;;  %p2765_p12 = por %p2764_p13, %p2763_p6 }
 0xa8b   : > { %p2759_p5 = pneg %p2758_p4 }
 0xa8d   : > { %p2766_p0 = pnand %p2765_p12, %p2759_p5 }
 0xa90   : > { %v2601_v41 = vpop.eup %2600 }
 0xa91   : > { %v1514_v42 = vmul.f32 %v2601_v41, %v2599_v32 }
 0xa93   : > { %v1515_v43 = vpack.c.bf16 %v1514_v42, %v1514_v42 }
 0xa95   : > { %2352 = vmatmul.mubr.msk.bf16.vlgmr.msra.gmra.mrb[24].mxu0 %vm983_vm3, %v1515_v43 }
 0xa96   : > { %2377 = vmatprep.mubr.msk.bf16.mxu0 %vm2899_vm1, %v2897_v4  ;;  %2362 = vmatpush3.bf16.msra.mxu0 %v2568_v60 }
 0xa97   : > { %2363 = vmatprep.subr.bf16.mxu0 %v2897_v4 }
 0xa9a   : > { %2364 = vmatpush3.bf16.msra.mxu0 %v2569_v61 }
 0xa9b   : > { %2365 = vmatprep.subr.bf16.mxu0 %v2897_v4 }
 0xa9e   : > { %2366 = vmatpush3.bf16.msra.mxu0 %v2570_v3 }
 0xa9f   : > { %2367 = vmatprep.subr.bf16.mxu0 %v2897_v4 }
 0xaa2   : > { %2368 = vmatpush3.bf16.msra.mxu0 %v2571_v5 }
 0xaa3   : > { %2369 = vmatprep.subr.bf16.mxu0 %v2897_v4 }
 0xaa6   : > { %2370 = vmatpush3.bf16.msra.mxu0 %v2572_v6 }
 0xaa7   : > { %2371 = vmatprep.subr.bf16.mxu0 %v2897_v4 }
 0xaaa   : > { %2372 = vmatpush3.bf16.msra.mxu0 %v2573_v7 }
 0xaab   : > { %2373 = vmatprep.subr.bf16.mxu0 %v2897_v4 }
 0xaae   : > { %2374 = vmatpush3.bf16.msra.mxu0 %v2574_v11 }
 0xaaf   : > { %2375 = vmatprep.subr.bf16.mxu0 %v2897_v4 }
 0xab2   : > { %2376 = vmatpush3.bf16.msra.mxu0 %v2575_v8 }
 0xb68   : > { %v1558_v44 = vpop.f32.mrb[24].mxu0 }
 0xb69   : > { %v1564_v45 = vpack.c.bf16 %v1558_v44, %v1558_v44  ;;  %v2353_v46 = vpop.f32.mrb[25].mxu0 }
 0xb6a   : > { %v1561_v48 = vpop.f32.mrb[26].mxu0 }
 0xb6b   : > { %v2354_v49 = vpop.f32.mrb[27].mxu0  ;;  %2358 = vmatmul.mubr.msk.bf16.vlgmr.msra.gmra.mrb[24].mxu1 %vm983_vm3, %v1564_v45 }
 0xb6c   : > { %2397 = vmatprep.mubr.msk.bf16.mxu1 %vm2899_vm1, %v2897_v4  ;;  %2382 = vmatpush3.bf16.msra.mxu1 %v2576_v9 }
 0xb6d   : > { %2383 = vmatprep.subr.bf16.mxu1 %v2897_v4 }
 0xb70   : > { %2384 = vmatpush3.bf16.msra.mxu1 %v2577_v19 }
 0xb71   : > { %2385 = vmatprep.subr.bf16.mxu1 %v2897_v4 }
 0xb74   : > { %2386 = vmatpush3.bf16.msra.mxu1 %v2578_v20 }
 0xb75   : > { %2387 = vmatprep.subr.bf16.mxu1 %v2897_v4 }
 0xb78   : > { %2388 = vmatpush3.bf16.msra.mxu1 %v2579_v21 }
 0xb79   : > { %2389 = vmatprep.subr.bf16.mxu1 %v2897_v4 }
 0xb7c   : > { %2390 = vmatpush3.bf16.msra.mxu1 %v2580_v22 }
 0xb7d   : > { %2391 = vmatprep.subr.bf16.mxu1 %v2897_v4 }
 0xb80   : > { %2392 = vmatpush3.bf16.msra.mxu1 %v2581_v23 }
 0xb81   : > { %2393 = vmatprep.subr.bf16.mxu1 %v2897_v4 }
 0xb84   : > { %2394 = vmatpush3.bf16.msra.mxu1 %v2582_v24 }
 0xb85   : > { %2395 = vmatprep.subr.bf16.mxu1 %v2897_v4 }
 0xb88   : > { %2396 = vmatpush3.bf16.msra.mxu1 %v2583_v25 }
 0xc3e   : > { %v1605_v51 = vpop.f32.mrb[24].mxu1 }
 0xc3f   : > { %v1611_v52 = vadd.f32 %v1605_v51, %v1453_v36  ;;  %v2359_v53 = vpop.f32.mrb[25].mxu1 }
 0xc40   : > { %v1608_v54 = vpop.f32.mrb[26].mxu1 }
 0xc41   : > { %v1612_v56 = vadd.f32 %v1611_v52, %v3376_v1  ;;  %v2360_v58 = vpop.f32.mrb[27].mxu1 }
 0xc43   : > { %v3543_v59 = vadd.f32 %v2190_v55, %v1612_v56 }
 0xc45   : > { %1623 = vadd.xlane.f32.xlu1 %v3543_v59 }
 0xcd2   : > { %v1624_v62 = vpop.xlane.xlu1 %1623 }
 0xcd3   : > { %v1625_v63 = vmul.f32 0.03125, %v1624_v62 }
 0xcd5   : > { %v1626_v1 = vsub.f32 %v3543_v59, %v1625_v63 }
 0xcd7   : > { %v1627_v0 = vsel %vm703_vm0, %v1626_v1, 0.0 }
 0xcd8   : > { %v1628_v2 = vmul.f32 %v1627_v0, %v1627_v0 }
 0xcda   : > { %1629 = vadd.xlane.f32.xlu1 %v1628_v2 }
 0xd67   : > { %v1630_v57 = vpop.xlane.xlu1 %1629 }
 0xd68   : > { %v1631_v10 = vmul.f32 0.03125, %v1630_v57 }
 0xd6a   : > { %v1632_v12 = vadd.f32 1e-05, %v1631_v10 }
 0xd6c   : > { %2602 = vrsqrt.f32 %v1632_v12 }
 0xd76   : > { %v2603_v13 = vpop.eup %2602 }
 0xd77   : > { %v1634_v15 = vmul.f32 %v2603_v13, %v1627_v0 }
 0xd79   : > { %v1641_v16 = vmul.f32 %v2191_v14, %v1634_v15 }
 0xd7b   : > { %v1648_v17 = vadd.f32 %v2192_v50, %v1641_v16 }
 0xd7d   : > { %v1649_v18 = vpack.c.bf16 %v1648_v17, %v1648_v17 }
 0xd7f   : > { %2378 = vmatmul.mubr.bf16.vlgmr.msra.gmra.mrb[28].mxu0 %v1649_v18 }
 0xe52   : > { %v1755_v27 = vpop.f32.mrb[28].mxu0 }
 0xe53   : > { %v1756_v28 = vadd.f32 %v2193_v26, %v1755_v27  ;;  %v2379_v29 = vpop.f32.mrb[29].mxu0 }
 0xe54   : > { %v1758_v30 = vpop.f32.mrb[30].mxu0 }
 0xe55   : > { %v1762_v31 = vmul.f32 0.044715, %v1756_v28  ;;  %v2380_v32 = vpop.f32.mrb[31].mxu0  ;;  %v1761_v36 = vmul.f32 0.5, %v1756_v28 }
 0xe57   : > { %v1763_v33 = vmul.f32 %v1762_v31, %v1756_v28 }
 0xe59   : > { %v1764_v34 = vmul.f32 %v1763_v33, %v1756_v28 }
 0xe5b   : > { %v1765_v35 = vadd.f32 %v1764_v34, %v1756_v28 }
 0xe5d   : > { %v1766_v47 = vmul.f32 0.7978846, %v1765_v35 }
 0xe5f   : > { %2604 = vtanh.f32 %v1766_v47 }
 0xe69   : > { %v2605_v4 = vpop.eup %2604 }
 0xe6a   : > { %v1768_v37 = vadd.f32 1.0, %v2605_v4 }
 0xe6c   : > { %v1769_v38 = vmul.f32 %v1768_v37, %v1761_v36 }
 0xe6e   : > { %v1770_v39 = vpack.c.bf16 %v1769_v38, %v1769_v38 }
 0xe70   : > { %2398 = vmatmul.mubr.bf16.vlgmr.msra.gmra.mrb[28].mxu1 %v1770_v39 }
 0xf43   : > { %v1876_v41 = vpop.f32.mrb[28].mxu1 }
 0xf44   : > { %v1877_v42 = vadd.f32 %v2202_v40, %v1876_v41  ;;  %v2399_v43 = vpop.f32.mrb[29].mxu1 }
 0xf45   : > { %v1879_v44 = vpop.f32.mrb[30].mxu1 }
 0xf46   : > { %v1882_v45 = vadd.f32 %v1877_v42, %v3543_v59  ;;  %v2400_v46 = vpop.f32.mrb[31].mxu1 }
 0xf48   : > { %1883 = vst [vmem:[#allocation2] sm:$0xff] %v1882_v45  ;;  %1884 = vst [vmem:[%s3373_s20] sm:$0xff] %v1882_v45 }
 0xf49   : > { %2769 = shalt.err (!%p2766_p0)
}
 0xf4a   : > { %s2770_s27 = scalar_lea.hbm %s3605_s13, 128  ;;  %s2774_s21 = scalar_lea.hbm %s3797_s18, 256 }
 0xf4b   : > { %p2771_p10 = scmp.ne.s32.totalorder %s3605_s13, %s2770_s27  ;;  %p2775_p1 = scmp.lt.u32.totalorder %s3605_s13, %s3797_s18 }
 0xf4c   : > { %p2776_p3 = scmp.lt.u32.totalorder %s2774_s21, %s2770_s27  ;;  %p2778_p11 = scmp.lt.u32.totalorder %s2770_s27, %s3605_s13 }
 0xf4d   : > { %p2772_p7 = pnand %p2771_p10, %p3798_p9 }
 0xf4e   : > { %p2777_p8 = por %p2776_p3, %p2775_p1 }
 0xf4f   : > { %p2773_p2 = pneg %p2772_p7 }
 0xf50   : > { %p2779_p4 = por %p2778_p11, %p2777_p8 }
 0xf52   : > { %p2780_p5 = pnand %p2779_p4, %p2773_p2 }
 0xf54   : > { %2783 = shalt.err (!%p2780_p5)
}
 0xf55   : > { %2414 = dma.vmem_to_hbm [thread:$0]  (%p3798_p9), %s3607_s4, 128, %s3605_s13, %s1886_s6  }
 0xf56 PF: > { %s3799_s7 = sld [smem:[#allocation26_spill]]  ;;  %s3800_s1 = sld [smem:[#allocation19_spill]] }
 0xf57   : > { %s3801_s2 = sld [smem:[#allocation35_spill]] }
 0xf5c   : > { %p2437_p6 = scmp.ge.s32.totalorder %s3799_s7, 2  ;;  %s1911_s14 = sand.u32 1, %s3800_s1  }
 0xf5d   : > { %p3802_p13 = scmp.ne.s32.totalorder %s3801_s2, 0  ;;  %s1912_s3 = scalar_lea.sflag [#allocation5], %s1911_s14 }
 0xf5f   : > { %p2433_p12 = pnand %p2437_p6, %p3802_p13 }
 0xf61   : > { %2841 = dma.done.wait (!%p2433_p12), %s1912_s3, 128  }
 0xf62   : > { %2843 = vsyncadd (!%p2433_p12), %s1912_s3, 4294967168  ;;  %s34_s13 = sadd.s32 1, %s3799_s7   ;;  %s3803_s21 = sld [smem:[#allocation17_spill]] }
 0xf63   : > { %p31_p0 = scmp.ge.s32.totalorder %s34_s13, 6   ;;  %s3804_s22 = sld [smem:[#allocation18_spill]] }
 0xf64   : > { %s3805_s23 = sld [smem:[#allocation32_spill]]  ;;  %s3806_s24 = sld [smem:[#allocation20_spill]] }
 0xf65   : > { %s3807_s25 = sld [smem:[#allocation21_spill]]  ;;  %s3808_s26 = sld [smem:[#allocation33_spill]] }
 0xf66   : > { %s3809_s27 = sld [smem:[#allocation24_spill]]  ;;  %s3810_s28 = sld [smem:[#allocation25_spill]] }
 0xf67   : > { %s3811_s29 = sld [smem:[#allocation28_spill]]  ;;  %s3812_s30 = sld [smem:[#allocation29_spill]] }
 0xf68   :  { %33 = sbr.rel (!%p31_p0) target bundleno = 27 (0x1b), region = 186 }
 0xf6f   :  { %1917 = vsyncpa [#allocation4], 1 }
 0xf70   :  { %1919 = vsyncpa [#allocation4 + $0x1], 1 }
 0xf71   :  { %1920 = vsyncpa [#allocation7], 1 }
 0xf72   :  { %1922 = vsyncpa [#allocation7 + $0x1], 1 }
 0xf73   :  { %1923 = vsyncpa [#allocation10], 1 }
 0xf74   :  { %1925 = vsyncpa [#allocation10 + $0x1], 1 }
 0xf75   :  { %1926 = vsyncpa [#allocation5], 1 }
 0xf76   :  { %1928 = vsyncpa [#allocation5 + $0x1], 1 }

</bundles_post_ra>
